<compile_context>
chip_gen: v7x
topology: tpu7x:2x2x1
jax: 0.10.0
libtpu: 0.0.40
codegen_flags: <defaults>
</compile_context>

<pallas_src>
import numpy as np
import jax
import jax.numpy as jnp
from jax.experimental import pallas as pl
from jax.experimental.pallas import tpu as pltpu

# ---- config (mirrors M.head_size / M.loss_weight in lcnn) -----------------
N_JTYP = 1
HEAD_SIZE = [[2 * N_JTYP], [2 * N_JTYP], [2 * N_JTYP], [2 * N_JTYP]]
NUM_CLASS = sum(sum(HEAD_SIZE, []))                # = 8 for n_jtyp = 1
HEAD_OFF = np.cumsum([sum(h) for h in HEAD_SIZE])  # [2, 4, 6, 8]
LOSS_WEIGHT = {"center": 1.0, "corner": 1.0,
               "corner_offset": 0.25, "corner_bin_offset": 1.0}
RATIO = 0.0005  # negative/positive ratio in heatmaplossl1


def _make_kernel(S, n_jtyp, loss_weight):
    n = n_jtyp
    C = 8 * n
    lw = (loss_weight["center"], loss_weight["corner"],
          loss_weight["corner_offset"], loss_weight["corner_bin_offset"])

    def kernel(w_ref, b_ref, scale_ref, img_ref, tck_ref, tco_ref, tcbo_ref,
               pck_ref, pco_ref, pcbo_ref, feat_ref, loss_ref):
        cin = img_ref.shape[0]
        N = img_ref.shape[1]
        inv_n = 1.0 / float(N)
        head_rows = S * C

        # ---- fused 1x1 head conv for ALL stacks + feature projection ------
        # For a real backbone (Cin >= ~128) this is a single bf16 MXU matmul;
        # for the tiny synthetic backbone (Cin = 4) an unrolled f32 VPU
        # outer-product FMA avoids MXU padding and stays bit-exact in f32.
        if cin >= 32:
            out = jnp.dot(w_ref[...], img_ref[...],
                          preferred_element_type=jnp.float32)
        else:
            w = w_ref[...].astype(jnp.float32)
            img = img_ref[...].astype(jnp.float32)
            out = w[:, 0:1] * img[0:1, :]
            for c in range(1, cin):
                out = out + w[:, c:c + 1] * img[c:c + 1, :]
        out = out + b_ref[...]                          # (S*C + Cfeat, N)

        feat_ref[...] = out[head_rows:, :]              # (Cfeat, N)

        tck = tck_ref[...]                              # (2n, N) [center|corner]
        tco = tco_ref[...]                              # (2n, N)
        tcbo = tcbo_ref[...]                            # (2n, N)
        co_scale = scale_ref[...]                       # (2n, 1) [H, W, H, W..]

        for s in range(S):                              # static unroll
            base = s * C
            # ---- 2-class cross entropy on the (2n, N) [center|corner] slab.
            # rows [0:2n) = class-0 logits, rows [2n:4n) = class-1 logits.
            d = out[base + 2 * n: base + 4 * n, :] - out[base: base + 2 * n, :]
            sp = jnp.maximum(d, 0.0) + jnp.log(1.0 + jnp.exp(-jnp.abs(d)))
            lmap = sp - tck * d                         # = pos*nlogp1+(1-pos)*nlogp0
            lrow = jnp.sum(lmap, axis=1, keepdims=True) * inv_n   # (2n, 1)
            loss_center = jnp.sum(lrow[0:n, :], axis=0, keepdims=True)
            loss_corner = jnp.sum(lrow[n:2 * n, :], axis=0, keepdims=True)

            # ---- corner offset: tanh, per-row scale, weighted smooth-L1 ---
            co_pred = jnp.tanh(out[base + 4 * n: base + 6 * n, :]) * co_scale
            dlt = co_pred - tco
            ad = jnp.abs(dlt)
            sl1 = jnp.where(ad < 1.0, 0.5 * dlt * dlt, ad - 0.5)
            sl1 = sl1 * jnp.where(tco != 0.0, 1.0, RATIO)
            loss_off = jnp.sum(jnp.sum(sl1, axis=1, keepdims=True),
                               axis=0, keepdims=True) * inv_n

            # ---- corner bin offset: sigmoid - 0.5, masked L1 ---------------
            lp = jax.nn.sigmoid(out[base + 6 * n: base + 8 * n, :]) - 0.5
            amap = jnp.abs(lp - tcbo)                   # (2n, N)
            loss_bin = jnp.zeros((1, 1), jnp.float32)
            for t in range(n):
                mask = tck[n + t: n + t + 1, :]         # corner target (1, N)
                wnorm = jnp.sum(mask, axis=1, keepdims=True) * inv_n
                wnorm = jnp.where(wnorm == 0.0, 1.0, wnorm)
                num = jnp.sum(
                    jnp.sum(amap[2 * t: 2 * t + 2, :] * mask,
                            axis=1, keepdims=True),
                    axis=0, keepdims=True) * inv_n
                loss_bin = loss_bin + num / wnorm       # exact divide

            # ---- predictions: only stack 0 is consumed downstream ----------
            if s == 0:
                pck_ref[...] = jnp.exp(d - sp)          # softmax(.)[class 1]
                pco_ref[...] = co_pred
                pcbo_ref[...] = lp

            loss_ref[s:s + 1, 0:1] = loss_center * lw[0]
            loss_ref[s:s + 1, 1:2] = loss_corner * lw[1]
            loss_ref[s:s + 1, 2:3] = loss_off * lw[2]
            loss_ref[s:s + 1, 3:4] = loss_bin * lw[3]

    return kernel


def multitask_forward(image, target, params, mode="training"):
    """JAX/Pallas port of MultitaskLearner.forward."""
    B, Cin, H, W = image.shape
    S, C, _ = params["wb"].shape
    n = target["corner"].shape[1]
    N = H * W
    Cfeat = params["wf"].shape[0]
    R = S * C + Cfeat
    assert C == 8 * n

    # --- row permutation (host side, tiny): per stack, move the class-0
    # logits of [center | corner] to rows [0, 2n) and the class-1 logits to
    # rows [2n, 4n); offset / bin-offset blocks keep their natural order.
    idx = np.arange(n)
    perm = np.concatenate([
        2 * idx,                 # center class-0
        2 * n + 2 * idx,         # corner class-0
        2 * idx + 1,             # center class-1
        2 * n + 2 * idx + 1,     # corner class-1
        4 * n + np.arange(4 * n),
    ])

    # --- synthetic backbone feature head is fused into the kernel.
    # TODO(synk): real lcnn uses a stacked-hourglass backbone; it is an
    # external constructor dependency and is replaced by a 1x1 conv here.
    wb = params["wb"][:, perm, :].reshape(S * C, Cin)
    bb = params["bb"][:, perm].reshape(S * C)
    w_all = jnp.concatenate([wb, params["wf"]], axis=0).astype(jnp.bfloat16)
    b_all = jnp.concatenate(
        [bb, jnp.zeros((Cfeat,), bb.dtype)]).reshape(R, 1).astype(jnp.float32)
    co_scale = jnp.tile(jnp.array([[float(H)], [float(W)]], jnp.float32),
                        (n, 1))                                       # (2n, 1)

    # --- flatten H*W onto the lane axis (free reshapes, no transposes) ------
    img = image.reshape(B, Cin, N).astype(jnp.bfloat16)
    t_ck = jnp.concatenate([target["center"], target["corner"]],
                           axis=1).reshape(B, 2 * n, N).astype(jnp.float32)
    t_co = target["corner_offset"].reshape(B, 2 * n, N).astype(jnp.float32)
    t_cbo = target["corner_bin_offset"].reshape(B, 2 * n, N).astype(jnp.float32)

    kernel = _make_kernel(S, n, LOSS_WEIGHT)

    out_shapes = (
        jax.ShapeDtypeStruct((B, 2 * n, N), jnp.float32),   # center|corner prob
        jax.ShapeDtypeStruct((B, 2 * n, N), jnp.float32),   # corner_offset
        jax.ShapeDtypeStruct((B, 2 * n, N), jnp.float32),   # corner_bin_offset
        jax.ShapeDtypeStruct((B, Cfeat, N), jnp.float32),   # feature
        jax.ShapeDtypeStruct((B, S, 4), jnp.float32),       # per-stack losses
    )

    grid_spec = pltpu.PrefetchScalarGridSpec(
        num_scalar_prefetch=0,
        grid=(B,),
        in_specs=[
            pl.BlockSpec((R, Cin), lambda b: (0, 0)),             # w_all (resident)
            pl.BlockSpec((R, 1), lambda b: (0, 0)),               # b_all (resident)
            pl.BlockSpec((2 * n, 1), lambda b: (0, 0)),           # tanh scale
            pl.BlockSpec((None, Cin, N), lambda b: (b, 0, 0)),    # image
            pl.BlockSpec((None, 2 * n, N), lambda b: (b, 0, 0)),  # T center|corner
            pl.BlockSpec((None, 2 * n, N), lambda b: (b, 0, 0)),  # T corner_offset
            pl.BlockSpec((None, 2 * n, N), lambda b: (b, 0, 0)),  # T corner_bin_off
        ],
        out_specs=(
            pl.BlockSpec((None, 2 * n, N), lambda b: (b, 0, 0)),
            pl.BlockSpec((None, 2 * n, N), lambda b: (b, 0, 0)),
            pl.BlockSpec((None, 2 * n, N), lambda b: (b, 0, 0)),
            pl.BlockSpec((None, Cfeat, N), lambda b: (b, 0, 0)),
            pl.BlockSpec((None, S, 4), lambda b: (b, 0, 0)),
        ),
    )

    pck, pco, pcbo, feat, loss_arr = pl.pallas_call(
        kernel,
        out_shape=out_shapes,
        grid_spec=grid_spec,
        compiler_params=pltpu.CompilerParams(
            dimension_semantics=("parallel",),
            vmem_limit_bytes=48 * 1024 * 1024),
    )(w_all, b_all, co_scale, img, t_ck, t_co, t_cbo)

    result = {
        "feature": feat.reshape(B, Cfeat, H, W),
        "preds": {
            "center": pck[:, :n].reshape(B, n, H, W),
            "corner": pck[:, n:].reshape(B, n, H, W),
            "corner_offset": pco.reshape(B, n, 2, H, W),
            "corner_bin_offset": pcbo.reshape(B, n, 2, H, W),
        },
    }
    if mode == "testing":
        return result

    loss_names = ["center", "corner", "corner_offset", "corner_bin_offset"]
    result["losses"] = [
        {name: loss_arr[:, s, k] for k, name in enumerate(loss_names)}
        for s in range(S)
    ]
    return result


# ---------------- pure-JAX reference (mirrors the torch code) ---------------
def _ref_forward(image, target, params):
    B, Cin, H, W = image.shape
    S = params["wb"].shape[0]
    n_jtyp = target["corner"].shape[1]
    off = HEAD_OFF

    outputs = (jnp.einsum("soc,bchw->sbohw", params["wb"], image)
               + params["bb"][:, None, :, None, None])
    feature = jnp.einsum("fc,bchw->bfhw", params["wf"], image)

    T = dict(target)
    T["center"] = jnp.transpose(T["center"], (1, 0, 2, 3))
    T["corner"] = jnp.transpose(T["corner"], (1, 0, 2, 3))
    T["corner_offset"] = jnp.transpose(T["corner_offset"], (1, 2, 0, 3, 4))
    T["corner_bin_offset"] = jnp.transpose(T["corner_bin_offset"], (1, 2, 0, 3, 4))

    def cross_entropy_loss(logits, positive):
        nlogp = -jax.nn.log_softmax(logits, axis=0)
        v = positive * nlogp[1] + (1 - positive) * nlogp[0]
        return jnp.mean(jnp.mean(v, axis=2), axis=1)

    def heatmaplossl1(inp, tgt):
        d = inp - tgt
        ad = jnp.abs(d)
        sl1 = jnp.where(ad < 1.0, 0.5 * d * d, ad - 0.5)
        maskpos = (tgt != 0).astype(jnp.float32)
        maskneg = (tgt == 0).astype(jnp.float32) * RATIO
        return jnp.mean(jnp.mean(maskpos * sl1 + maskneg * sl1, axis=2), axis=1)

    def sigmoid_l1_loss(logits, tgt, offset, mask):
        logp = jax.nn.sigmoid(logits) + offset
        loss = jnp.abs(logp - tgt)
        w = jnp.mean(jnp.mean(mask, axis=2, keepdims=True), axis=1, keepdims=True)
        w = jnp.where(w == 0, 1.0, w)
        return jnp.mean(jnp.mean(loss * (mask / w), axis=2), axis=1)

    result = {"feature": feature}
    losses = []
    for s in range(S):
        output = jnp.transpose(outputs[s], (1, 0, 2, 3)).reshape(-1, B, H, W)
        center = output[0:off[0]].reshape(n_jtyp, 2, B, H, W)
        corner = output[off[0]:off[1]].reshape(n_jtyp, 2, B, H, W)
        tmp = jnp.tanh(output[off[1]:off[2]].reshape(n_jtyp, 2, B, H, W))
        corner_offset = jnp.stack([tmp[:, 0] * H, tmp[:, 1] * W], axis=1)
        corner_bin_offset = output[off[2]:off[3]].reshape(n_jtyp, 2, B, H, W)
        if s == 0:
            result["preds"] = {
                "center": jax.nn.softmax(
                    jnp.transpose(center, (2, 0, 1, 3, 4)), axis=2)[:, :, 1],
                "corner": jax.nn.softmax(
                    jnp.transpose(corner, (2, 0, 1, 3, 4)), axis=2)[:, :, 1],
                "corner_offset": jnp.transpose(corner_offset, (2, 0, 1, 3, 4)),
                "corner_bin_offset": jax.nn.sigmoid(
                    jnp.transpose(corner_bin_offset, (2, 0, 1, 3, 4))) - 0.5,
            }
        L = {}
        L["center"] = sum(cross_entropy_loss(center[i], T["center"][i])
                          for i in range(n_jtyp))
        L["corner"] = sum(cross_entropy_loss(corner[i], T["corner"][i])
                          for i in range(n_jtyp))
        L["corner_offset"] = sum(
            heatmaplossl1(corner_offset[i, j], T["corner_offset"][i, j])
            for i in range(n_jtyp) for j in range(2))
        L["corner_bin_offset"] = sum(
            sigmoid_l1_loss(corner_bin_offset[i, j], T["corner_bin_offset"][i, j],
                            -0.5, T["corner"][i])
            for i in range(n_jtyp) for j in range(2))
        losses.append({k: v * LOSS_WEIGHT[k] for k, v in L.items()})
    result["losses"] = losses
    return result


def _bf16_round(x):
    # Round synthetic weights / inputs to bf16-representable values so the
    # bf16-fed in-kernel conv and the reference einsum agree regardless of
    # which matmul precision/path each side uses.
    return x.astype(jnp.bfloat16).astype(jnp.float32)


if __name__ == "__main__":
    key = jax.random.PRNGKey(0)
    B, Cin, H, W = 2, 4, 16, 16
    S = 2            # number of hourglass stacks
    Cfeat = 8
    n_jtyp = N_JTYP

    keys = jax.random.split(key, 9)
    image = _bf16_round(jax.random.normal(keys[0], (B, Cin, H, W), jnp.float32))
    params = {
        "wb": _bf16_round(0.5 * jax.random.normal(keys[1], (S, NUM_CLASS, Cin),
                                                  jnp.float32)),
        "bb": _bf16_round(0.1 * jax.random.normal(keys[2], (S, NUM_CLASS),
                                                  jnp.float32)),
        "wf": _bf16_round(0.5 * jax.random.normal(keys[3], (Cfeat, Cin),
                                                  jnp.float32)),
    }
    target = {
        "center": (jax.random.uniform(keys[4], (B, n_jtyp, H, W)) < 0.1
                   ).astype(jnp.float32),
        "corner": (jax.random.uniform(keys[5], (B, n_jtyp, H, W)) < 0.1
                   ).astype(jnp.float32),
        "corner_offset": (jax.random.normal(keys[6], (B, n_jtyp, 2, H, W),
                                            jnp.float32)
                          * (jax.random.uniform(keys[7], (B, n_jtyp, 2, H, W))
                             < 0.3).astype(jnp.float32)),
        "corner_bin_offset": jax.random.uniform(
            keys[8], (B, n_jtyp, 2, H, W), minval=-0.5, maxval=0.5),
    }

    result = multitask_forward(image, target, params, mode="training")
    jax.tree_util.tree_map(jax.block_until_ready, result)

    ref = _ref_forward(image, target, params)
    for name in ["center", "corner", "corner_offset", "corner_bin_offset"]:
        np.testing.assert_allclose(np.asarray(result["preds"][name]),
                                   np.asarray(ref["preds"][name]),
                                   rtol=2e-3, atol=2e-3)
        for s in range(S):
            np.testing.assert_allclose(np.asarray(result["losses"][s][name]),
                                       np.asarray(ref["losses"][s][name]),
                                       rtol=2e-3, atol=2e-3)

    print("KERNEL_OK")
</pallas_src>

<mosaic_0001>
module attributes {stable_mosaic.version = 11 : i64} {
  func.func @kernel(%arg0: i32, %arg1: memref<24x4xbf16, #tpu.memory_space<vmem>>, %arg2: memref<24x1xf32, #tpu.memory_space<vmem>>, %arg3: memref<2x1xf32, #tpu.memory_space<vmem>>, %arg4: memref<1x4x256xbf16, #tpu.memory_space<vmem>>, %arg5: memref<1x2x256xf32, #tpu.memory_space<vmem>>, %arg6: memref<1x2x256xf32, #tpu.memory_space<vmem>>, %arg7: memref<1x2x256xf32, #tpu.memory_space<vmem>>, %arg8: memref<1x2x256xf32, #tpu.memory_space<vmem>>, %arg9: memref<1x2x256xf32, #tpu.memory_space<vmem>>, %arg10: memref<1x2x256xf32, #tpu.memory_space<vmem>>, %arg11: memref<1x8x256xf32, #tpu.memory_space<vmem>>, %arg12: memref<1x2x4xf32, #tpu.memory_space<vmem>>) attributes {dimension_semantics = [#tpu.dimension_semantics<parallel>], iteration_bounds = array<i64: 2>, scalar_prefetch = 0 : i64, scratch_operands = 0 : i64, tpu.core_type = #tpu.core_type<tc>, window_params = [{pipeline_mode = #tpu.pipeline_mode<synchronous>, transform_indices = @transform_0, window_bounds = array<i64: 24, 4>}, {pipeline_mode = #tpu.pipeline_mode<synchronous>, transform_indices = @transform_1, window_bounds = array<i64: 24, 1>}, {pipeline_mode = #tpu.pipeline_mode<synchronous>, transform_indices = @transform_2, window_bounds = array<i64: 2, 1>}, {transform_indices = @transform_3, window_bounds = array<i64: 1, 4, 256>}, {transform_indices = @transform_4, window_bounds = array<i64: 1, 2, 256>}, {transform_indices = @transform_5, window_bounds = array<i64: 1, 2, 256>}, {transform_indices = @transform_6, window_bounds = array<i64: 1, 2, 256>}, {transform_indices = @transform_7, window_bounds = array<i64: 1, 2, 256>}, {transform_indices = @transform_8, window_bounds = array<i64: 1, 2, 256>}, {transform_indices = @transform_9, window_bounds = array<i64: 1, 2, 256>}, {transform_indices = @transform_10, window_bounds = array<i64: 1, 8, 256>}, {transform_indices = @transform_11, window_bounds = array<i64: 1, 2, 4>}]} {
    %c0 = arith.constant 0 : index
    %c0_0 = arith.constant 0 : index
    %0 = vector.load %arg1[%c0, %c0_0] : memref<24x4xbf16, #tpu.memory_space<vmem>>, vector<24x4xbf16>
    %1 = arith.extf %0 : vector<24x4xbf16> to vector<24x4xf32>
    %c0_1 = arith.constant 0 : index
    %c0_2 = arith.constant 0 : index
    %c0_3 = arith.constant 0 : index
    %2 = vector.load %arg4[%c0_1, %c0_2, %c0_3] : memref<1x4x256xbf16, #tpu.memory_space<vmem>>, vector<1x4x256xbf16>
    %3 = vector.shape_cast %2 : vector<1x4x256xbf16> to vector<4x256xbf16>
    %4 = arith.extf %3 : vector<4x256xbf16> to vector<4x256xf32>
    %5 = vector.extract_strided_slice %1 {offsets = [0, 0], sizes = [24, 1], strides = [1, 1]} : vector<24x4xf32> to vector<24x1xf32>
    %6 = vector.extract_strided_slice %4 {offsets = [0, 0], sizes = [1, 256], strides = [1, 1]} : vector<4x256xf32> to vector<1x256xf32>
    %7 = vector.broadcast %5 : vector<24x1xf32> to vector<24x256xf32>
    %8 = vector.broadcast %6 : vector<1x256xf32> to vector<24x256xf32>
    %9 = arith.mulf %7, %8 : vector<24x256xf32>
    %10 = vector.extract_strided_slice %1 {offsets = [0, 1], sizes = [24, 1], strides = [1, 1]} : vector<24x4xf32> to vector<24x1xf32>
    %11 = vector.extract_strided_slice %4 {offsets = [1, 0], sizes = [1, 256], strides = [1, 1]} : vector<4x256xf32> to vector<1x256xf32>
    %12 = vector.broadcast %10 : vector<24x1xf32> to vector<24x256xf32>
    %13 = vector.broadcast %11 : vector<1x256xf32> to vector<24x256xf32>
    %14 = arith.mulf %12, %13 : vector<24x256xf32>
    %15 = arith.addf %9, %14 : vector<24x256xf32>
    %16 = vector.extract_strided_slice %1 {offsets = [0, 2], sizes = [24, 1], strides = [1, 1]} : vector<24x4xf32> to vector<24x1xf32>
    %17 = vector.extract_strided_slice %4 {offsets = [2, 0], sizes = [1, 256], strides = [1, 1]} : vector<4x256xf32> to vector<1x256xf32>
    %18 = vector.broadcast %16 : vector<24x1xf32> to vector<24x256xf32>
    %19 = vector.broadcast %17 : vector<1x256xf32> to vector<24x256xf32>
    %20 = arith.mulf %18, %19 : vector<24x256xf32>
    %21 = arith.addf %15, %20 : vector<24x256xf32>
    %22 = vector.extract_strided_slice %1 {offsets = [0, 3], sizes = [24, 1], strides = [1, 1]} : vector<24x4xf32> to vector<24x1xf32>
    %23 = vector.extract_strided_slice %4 {offsets = [3, 0], sizes = [1, 256], strides = [1, 1]} : vector<4x256xf32> to vector<1x256xf32>
    %24 = vector.broadcast %22 : vector<24x1xf32> to vector<24x256xf32>
    %25 = vector.broadcast %23 : vector<1x256xf32> to vector<24x256xf32>
    %26 = arith.mulf %24, %25 : vector<24x256xf32>
    %27 = arith.addf %21, %26 : vector<24x256xf32>
    %c0_4 = arith.constant 0 : index
    %c0_5 = arith.constant 0 : index
    %28 = vector.load %arg2[%c0_4, %c0_5] : memref<24x1xf32, #tpu.memory_space<vmem>>, vector<24x1xf32>
    %29 = vector.broadcast %28 : vector<24x1xf32> to vector<24x256xf32>
    %30 = arith.addf %27, %29 : vector<24x256xf32>
    %31 = vector.extract_strided_slice %30 {offsets = [16, 0], sizes = [8, 256], strides = [1, 1]} : vector<24x256xf32> to vector<8x256xf32>
    %c0_6 = arith.constant 0 : index
    %c0_7 = arith.constant 0 : index
    %c0_8 = arith.constant 0 : index
    %32 = vector.load %arg11[%c0_6, %c0_7, %c0_8] : memref<1x8x256xf32, #tpu.memory_space<vmem>>, vector<1x8x256xf32>
    %33 = vector.shape_cast %32 : vector<1x8x256xf32> to vector<8x256xf32>
    %34 = vector.shape_cast %31 : vector<8x256xf32> to vector<1x8x256xf32>
    tpu.vector_store %arg11[%c0_6, %c0_7, %c0_8], %34 {strides = array<i32>} : memref<1x8x256xf32, #tpu.memory_space<vmem>>, vector<1x8x256xf32>,
    %c0_9 = arith.constant 0 : index
    %c0_10 = arith.constant 0 : index
    %c0_11 = arith.constant 0 : index
    %35 = vector.load %arg5[%c0_9, %c0_10, %c0_11] : memref<1x2x256xf32, #tpu.memory_space<vmem>>, vector<1x2x256xf32>
    %36 = vector.shape_cast %35 : vector<1x2x256xf32> to vector<2x256xf32>
    %c0_12 = arith.constant 0 : index
    %c0_13 = arith.constant 0 : index
    %c0_14 = arith.constant 0 : index
    %37 = vector.load %arg6[%c0_12, %c0_13, %c0_14] : memref<1x2x256xf32, #tpu.memory_space<vmem>>, vector<1x2x256xf32>
    %38 = vector.shape_cast %37 : vector<1x2x256xf32> to vector<2x256xf32>
    %c0_15 = arith.constant 0 : index
    %c0_16 = arith.constant 0 : index
    %c0_17 = arith.constant 0 : index
    %39 = vector.load %arg7[%c0_15, %c0_16, %c0_17] : memref<1x2x256xf32, #tpu.memory_space<vmem>>, vector<1x2x256xf32>
    %40 = vector.shape_cast %39 : vector<1x2x256xf32> to vector<2x256xf32>
    %c0_18 = arith.constant 0 : index
    %c0_19 = arith.constant 0 : index
    %41 = vector.load %arg3[%c0_18, %c0_19] : memref<2x1xf32, #tpu.memory_space<vmem>>, vector<2x1xf32>
    %42 = vector.extract_strided_slice %30 {offsets = [2, 0], sizes = [2, 256], strides = [1, 1]} : vector<24x256xf32> to vector<2x256xf32>
    %43 = vector.extract_strided_slice %30 {offsets = [0, 0], sizes = [2, 256], strides = [1, 1]} : vector<24x256xf32> to vector<2x256xf32>
    %44 = arith.subf %42, %43 : vector<2x256xf32>
    %cst = arith.constant 0.000000e+00 : f32
    %45 = vector.broadcast %cst : f32 to vector<2x256xf32>
    %46 = arith.maximumf %44, %45 : vector<2x256xf32>
    %47 = math.absf %44 : vector<2x256xf32>
    %cst_20 = arith.constant 0.000000e+00 : f32
    %48 = vector.broadcast %cst_20 : f32 to vector<2x256xf32>
    %49 = arith.subf %48, %47 : vector<2x256xf32>
    %50 = math.exp %49 : vector<2x256xf32>
    %cst_21 = arith.constant 1.000000e+00 : f32
    %51 = vector.broadcast %cst_21 : f32 to vector<2x256xf32>
    %52 = arith.addf %51, %50 : vector<2x256xf32>
    %53 = math.log %52 : vector<2x256xf32>
    %54 = arith.addf %46, %53 : vector<2x256xf32>
    %55 = arith.mulf %36, %44 : vector<2x256xf32>
    %56 = arith.subf %54, %55 : vector<2x256xf32>
    %cst_22 = arith.constant dense<0.000000e+00> : vector<2xf32>
    %57 = vector.multi_reduction <add>, %56, %cst_22 [1] : vector<2x256xf32> to vector<2xf32>
    %58 = vector.shape_cast %57 : vector<2xf32> to vector<2x1xf32>
    %cst_23 = arith.constant 3.906250e-03 : f32
    %59 = vector.broadcast %cst_23 : f32 to vector<2x1xf32>
    %60 = arith.mulf %58, %59 : vector<2x1xf32>
    %61 = vector.extract_strided_slice %60 {offsets = [0, 0], sizes = [1, 1], strides = [1, 1]} : vector<2x1xf32> to vector<1x1xf32>
    %cst_24 = arith.constant dense<0.000000e+00> : vector<1xf32>
    %62 = vector.multi_reduction <add>, %61, %cst_24 [0] : vector<1x1xf32> to vector<1xf32>
    %63 = vector.shape_cast %62 : vector<1xf32> to vector<1x1xf32>
    %64 = vector.extract_strided_slice %60 {offsets = [1, 0], sizes = [1, 1], strides = [1, 1]} : vector<2x1xf32> to vector<1x1xf32>
    %cst_25 = arith.constant dense<0.000000e+00> : vector<1xf32>
    %65 = vector.multi_reduction <add>, %64, %cst_25 [0] : vector<1x1xf32> to vector<1xf32>
    %66 = vector.shape_cast %65 : vector<1xf32> to vector<1x1xf32>
    %67 = vector.extract_strided_slice %30 {offsets = [4, 0], sizes = [2, 256], strides = [1, 1]} : vector<24x256xf32> to vector<2x256xf32>
    %68 = math.tanh %67 : vector<2x256xf32>
    %69 = vector.broadcast %41 : vector<2x1xf32> to vector<2x256xf32>
    %70 = arith.mulf %68, %69 : vector<2x256xf32>
    %71 = arith.subf %70, %38 : vector<2x256xf32>
    %72 = math.absf %71 : vector<2x256xf32>
    %cst_26 = arith.constant 1.000000e+00 : f32
    %73 = vector.broadcast %cst_26 : f32 to vector<2x256xf32>
    %74 = arith.cmpf olt, %72, %73 : vector<2x256xf32>
    %cst_27 = arith.constant 5.000000e-01 : f32
    %75 = vector.broadcast %cst_27 : f32 to vector<2x256xf32>
    %76 = arith.mulf %75, %71 : vector<2x256xf32>
    %77 = arith.mulf %76, %71 : vector<2x256xf32>
    %cst_28 = arith.constant 5.000000e-01 : f32
    %78 = vector.broadcast %cst_28 : f32 to vector<2x256xf32>
    %79 = arith.subf %72, %78 : vector<2x256xf32>
    %80 = arith.select %74, %77, %79 : vector<2x256xi1>, vector<2x256xf32>
    %cst_29 = arith.constant 0.000000e+00 : f32
    %81 = vector.broadcast %cst_29 : f32 to vector<2x256xf32>
    %82 = arith.cmpf one, %38, %81 : vector<2x256xf32>
    %cst_30 = arith.constant 1.000000e+00 : f32
    %cst_31 = arith.constant 5.000000e-04 : f32
    %83 = vector.broadcast %cst_30 : f32 to vector<2x256xf32>
    %84 = vector.broadcast %cst_31 : f32 to vector<2x256xf32>
    %85 = arith.select %82, %83, %84 : vector<2x256xi1>, vector<2x256xf32>
    %86 = arith.mulf %80, %85 : vector<2x256xf32>
    %cst_32 = arith.constant dense<0.000000e+00> : vector<2xf32>
    %87 = vector.multi_reduction <add>, %86, %cst_32 [1] : vector<2x256xf32> to vector<2xf32>
    %88 = vector.shape_cast %87 : vector<2xf32> to vector<2x1xf32>
    %cst_33 = arith.constant dense<0.000000e+00> : vector<1xf32>
    %89 = vector.multi_reduction <add>, %88, %cst_33 [0] : vector<2x1xf32> to vector<1xf32>
    %90 = vector.shape_cast %89 : vector<1xf32> to vector<1x1xf32>
    %cst_34 = arith.constant 3.906250e-03 : f32
    %91 = vector.broadcast %cst_34 : f32 to vector<1x1xf32>
    %92 = arith.mulf %90, %91 : vector<1x1xf32>
    %93 = vector.extract_strided_slice %30 {offsets = [6, 0], sizes = [2, 256], strides = [1, 1]} : vector<24x256xf32> to vector<2x256xf32>
    %94 = arith.negf %93 : vector<2x256xf32>
    %95 = math.exp %94 : vector<2x256xf32>
    %cst_35 = arith.constant 1.000000e+00 : f32
    %96 = vector.broadcast %cst_35 : f32 to vector<2x256xf32>
    %97 = arith.addf %96, %95 : vector<2x256xf32>
    %98 = arith.divf %96, %97 : vector<2x256xf32>
    %cst_36 = arith.constant 5.000000e-01 : f32
    %99 = vector.broadcast %cst_36 : f32 to vector<2x256xf32>
    %100 = arith.subf %98, %99 : vector<2x256xf32>
    %101 = arith.subf %100, %40 : vector<2x256xf32>
    %102 = math.absf %101 : vector<2x256xf32>
    %cst_37 = arith.constant 0.000000e+00 : f32
    %103 = vector.broadcast %cst_37 : f32 to vector<1x1xf32>
    %104 = vector.extract_strided_slice %36 {offsets = [1, 0], sizes = [1, 256], strides = [1, 1]} : vector<2x256xf32> to vector<1x256xf32>
    %cst_38 = arith.constant dense<0.000000e+00> : vector<1xf32>
    %105 = vector.multi_reduction <add>, %104, %cst_38 [1] : vector<1x256xf32> to vector<1xf32>
    %106 = vector.shape_cast %105 : vector<1xf32> to vector<1x1xf32>
    %cst_39 = arith.constant 3.906250e-03 : f32
    %107 = vector.broadcast %cst_39 : f32 to vector<1x1xf32>
    %108 = arith.mulf %106, %107 : vector<1x1xf32>
    %cst_40 = arith.constant 0.000000e+00 : f32
    %109 = vector.broadcast %cst_40 : f32 to vector<1x1xf32>
    %110 = arith.cmpf oeq, %108, %109 : vector<1x1xf32>
    %cst_41 = arith.constant 1.000000e+00 : f32
    %111 = vector.broadcast %cst_41 : f32 to vector<1x1xf32>
    %112 = arith.select %110, %111, %108 : vector<1x1xi1>, vector<1x1xf32>
    %113 = vector.broadcast %104 : vector<1x256xf32> to vector<2x256xf32>
    %114 = arith.mulf %102, %113 : vector<2x256xf32>
    %cst_42 = arith.constant dense<0.000000e+00> : vector<2xf32>
    %115 = vector.multi_reduction <add>, %114, %cst_42 [1] : vector<2x256xf32> to vector<2xf32>
    %116 = vector.shape_cast %115 : vector<2xf32> to vector<2x1xf32>
    %cst_43 = arith.constant dense<0.000000e+00> : vector<1xf32>
    %117 = vector.multi_reduction <add>, %116, %cst_43 [0] : vector<2x1xf32> to vector<1xf32>
    %118 = vector.shape_cast %117 : vector<1xf32> to vector<1x1xf32>
    %cst_44 = arith.constant 3.906250e-03 : f32
    %119 = vector.broadcast %cst_44 : f32 to vector<1x1xf32>
    %120 = arith.mulf %118, %119 : vector<1x1xf32>
    %121 = arith.divf %120, %112 : vector<1x1xf32>
    %122 = arith.addf %103, %121 : vector<1x1xf32>
    %123 = arith.subf %44, %54 : vector<2x256xf32>
    %124 = math.exp %123 : vector<2x256xf32>
    %c0_45 = arith.constant 0 : index
    %c0_46 = arith.constant 0 : index
    %c0_47 = arith.constant 0 : index
    %125 = vector.load %arg8[%c0_45, %c0_46, %c0_47] : memref<1x2x256xf32, #tpu.memory_space<vmem>>, vector<1x2x256xf32>
    %126 = vector.shape_cast %125 : vector<1x2x256xf32> to vector<2x256xf32>
    %127 = vector.shape_cast %124 : vector<2x256xf32> to vector<1x2x256xf32>
    tpu.vector_store %arg8[%c0_45, %c0_46, %c0_47], %127 {strides = array<i32>} : memref<1x2x256xf32, #tpu.memory_space<vmem>>, vector<1x2x256xf32>,
    %c0_48 = arith.constant 0 : index
    %c0_49 = arith.constant 0 : index
    %c0_50 = arith.constant 0 : index
    %128 = vector.load %arg9[%c0_48, %c0_49, %c0_50] : memref<1x2x256xf32, #tpu.memory_space<vmem>>, vector<1x2x256xf32>
    %129 = vector.shape_cast %128 : vector<1x2x256xf32> to vector<2x256xf32>
    %130 = vector.shape_cast %70 : vector<2x256xf32> to vector<1x2x256xf32>
    tpu.vector_store %arg9[%c0_48, %c0_49, %c0_50], %130 {strides = array<i32>} : memref<1x2x256xf32, #tpu.memory_space<vmem>>, vector<1x2x256xf32>,
    %c0_51 = arith.constant 0 : index
    %c0_52 = arith.constant 0 : index
    %c0_53 = arith.constant 0 : index
    %131 = vector.load %arg10[%c0_51, %c0_52, %c0_53] : memref<1x2x256xf32, #tpu.memory_space<vmem>>, vector<1x2x256xf32>
    %132 = vector.shape_cast %131 : vector<1x2x256xf32> to vector<2x256xf32>
    %133 = vector.shape_cast %100 : vector<2x256xf32> to vector<1x2x256xf32>
    tpu.vector_store %arg10[%c0_51, %c0_52, %c0_53], %133 {strides = array<i32>} : memref<1x2x256xf32, #tpu.memory_space<vmem>>, vector<1x2x256xf32>,
    %cst_54 = arith.constant 1.000000e+00 : f32
    %134 = vector.broadcast %cst_54 : f32 to vector<1x1xf32>
    %135 = arith.mulf %63, %134 : vector<1x1xf32>
    %c0_55 = arith.constant 0 : index
    %c0_56 = arith.constant 0 : index
    %c0_57 = arith.constant 0 : index
    %136 = vector.load %arg12[%c0_55, %c0_56, %c0_57] : memref<1x2x4xf32, #tpu.memory_space<vmem>>, vector<1x1x1xf32>
    %137 = vector.shape_cast %136 : vector<1x1x1xf32> to vector<1x1xf32>
    %138 = vector.shape_cast %135 : vector<1x1xf32> to vector<1x1x1xf32>
    tpu.vector_store %arg12[%c0_55, %c0_56, %c0_57], %138 {strides = array<i32>} : memref<1x2x4xf32, #tpu.memory_space<vmem>>, vector<1x1x1xf32>,
    %cst_58 = arith.constant 1.000000e+00 : f32
    %139 = vector.broadcast %cst_58 : f32 to vector<1x1xf32>
    %140 = arith.mulf %66, %139 : vector<1x1xf32>
    %c0_59 = arith.constant 0 : index
    %c0_60 = arith.constant 0 : index
    %c1 = arith.constant 1 : index
    %141 = vector.load %arg12[%c0_59, %c0_60, %c1] : memref<1x2x4xf32, #tpu.memory_space<vmem>>, vector<1x1x1xf32>
    %142 = vector.shape_cast %141 : vector<1x1x1xf32> to vector<1x1xf32>
    %143 = vector.shape_cast %140 : vector<1x1xf32> to vector<1x1x1xf32>
    tpu.vector_store %arg12[%c0_59, %c0_60, %c1], %143 {strides = array<i32>} : memref<1x2x4xf32, #tpu.memory_space<vmem>>, vector<1x1x1xf32>,
    %cst_61 = arith.constant 2.500000e-01 : f32
    %144 = vector.broadcast %cst_61 : f32 to vector<1x1xf32>
    %145 = arith.mulf %92, %144 : vector<1x1xf32>
    %c0_62 = arith.constant 0 : index
    %c0_63 = arith.constant 0 : index
    %c2 = arith.constant 2 : index
    %146 = vector.load %arg12[%c0_62, %c0_63, %c2] : memref<1x2x4xf32, #tpu.memory_space<vmem>>, vector<1x1x1xf32>
    %147 = vector.shape_cast %146 : vector<1x1x1xf32> to vector<1x1xf32>
    %148 = vector.shape_cast %145 : vector<1x1xf32> to vector<1x1x1xf32>
    tpu.vector_store %arg12[%c0_62, %c0_63, %c2], %148 {strides = array<i32>} : memref<1x2x4xf32, #tpu.memory_space<vmem>>, vector<1x1x1xf32>,
    %cst_64 = arith.constant 1.000000e+00 : f32
    %149 = vector.broadcast %cst_64 : f32 to vector<1x1xf32>
    %150 = arith.mulf %122, %149 : vector<1x1xf32>
    %c0_65 = arith.constant 0 : index
    %c0_66 = arith.constant 0 : index
    %c3 = arith.constant 3 : index
    %151 = vector.load %arg12[%c0_65, %c0_66, %c3] : memref<1x2x4xf32, #tpu.memory_space<vmem>>, vector<1x1x1xf32>
    %152 = vector.shape_cast %151 : vector<1x1x1xf32> to vector<1x1xf32>
    %153 = vector.shape_cast %150 : vector<1x1xf32> to vector<1x1x1xf32>
    tpu.vector_store %arg12[%c0_65, %c0_66, %c3], %153 {strides = array<i32>} : memref<1x2x4xf32, #tpu.memory_space<vmem>>, vector<1x1x1xf32>,
    %154 = vector.extract_strided_slice %30 {offsets = [10, 0], sizes = [2, 256], strides = [1, 1]} : vector<24x256xf32> to vector<2x256xf32>
    %155 = vector.extract_strided_slice %30 {offsets = [8, 0], sizes = [2, 256], strides = [1, 1]} : vector<24x256xf32> to vector<2x256xf32>
    %156 = arith.subf %154, %155 : vector<2x256xf32>
    %cst_67 = arith.constant 0.000000e+00 : f32
    %157 = vector.broadcast %cst_67 : f32 to vector<2x256xf32>
    %158 = arith.maximumf %156, %157 : vector<2x256xf32>
    %159 = math.absf %156 : vector<2x256xf32>
    %cst_68 = arith.constant 0.000000e+00 : f32
    %160 = vector.broadcast %cst_68 : f32 to vector<2x256xf32>
    %161 = arith.subf %160, %159 : vector<2x256xf32>
    %162 = math.exp %161 : vector<2x256xf32>
    %cst_69 = arith.constant 1.000000e+00 : f32
    %163 = vector.broadcast %cst_69 : f32 to vector<2x256xf32>
    %164 = arith.addf %163, %162 : vector<2x256xf32>
    %165 = math.log %164 : vector<2x256xf32>
    %166 = arith.addf %158, %165 : vector<2x256xf32>
    %167 = arith.mulf %36, %156 : vector<2x256xf32>
    %168 = arith.subf %166, %167 : vector<2x256xf32>
    %cst_70 = arith.constant dense<0.000000e+00> : vector<2xf32>
    %169 = vector.multi_reduction <add>, %168, %cst_70 [1] : vector<2x256xf32> to vector<2xf32>
    %170 = vector.shape_cast %169 : vector<2xf32> to vector<2x1xf32>
    %cst_71 = arith.constant 3.906250e-03 : f32
    %171 = vector.broadcast %cst_71 : f32 to vector<2x1xf32>
    %172 = arith.mulf %170, %171 : vector<2x1xf32>
    %173 = vector.extract_strided_slice %172 {offsets = [0, 0], sizes = [1, 1], strides = [1, 1]} : vector<2x1xf32> to vector<1x1xf32>
    %cst_72 = arith.constant dense<0.000000e+00> : vector<1xf32>
    %174 = vector.multi_reduction <add>, %173, %cst_72 [0] : vector<1x1xf32> to vector<1xf32>
    %175 = vector.shape_cast %174 : vector<1xf32> to vector<1x1xf32>
    %176 = vector.extract_strided_slice %172 {offsets = [1, 0], sizes = [1, 1], strides = [1, 1]} : vector<2x1xf32> to vector<1x1xf32>
    %cst_73 = arith.constant dense<0.000000e+00> : vector<1xf32>
    %177 = vector.multi_reduction <add>, %176, %cst_73 [0] : vector<1x1xf32> to vector<1xf32>
    %178 = vector.shape_cast %177 : vector<1xf32> to vector<1x1xf32>
    %179 = vector.extract_strided_slice %30 {offsets = [12, 0], sizes = [2, 256], strides = [1, 1]} : vector<24x256xf32> to vector<2x256xf32>
    %180 = math.tanh %179 : vector<2x256xf32>
    %181 = vector.broadcast %41 : vector<2x1xf32> to vector<2x256xf32>
    %182 = arith.mulf %180, %181 : vector<2x256xf32>
    %183 = arith.subf %182, %38 : vector<2x256xf32>
    %184 = math.absf %183 : vector<2x256xf32>
    %cst_74 = arith.constant 1.000000e+00 : f32
    %185 = vector.broadcast %cst_74 : f32 to vector<2x256xf32>
    %186 = arith.cmpf olt, %184, %185 : vector<2x256xf32>
    %cst_75 = arith.constant 5.000000e-01 : f32
    %187 = vector.broadcast %cst_75 : f32 to vector<2x256xf32>
    %188 = arith.mulf %187, %183 : vector<2x256xf32>
    %189 = arith.mulf %188, %183 : vector<2x256xf32>
    %cst_76 = arith.constant 5.000000e-01 : f32
    %190 = vector.broadcast %cst_76 : f32 to vector<2x256xf32>
    %191 = arith.subf %184, %190 : vector<2x256xf32>
    %192 = arith.select %186, %189, %191 : vector<2x256xi1>, vector<2x256xf32>
    %cst_77 = arith.constant 0.000000e+00 : f32
    %193 = vector.broadcast %cst_77 : f32 to vector<2x256xf32>
    %194 = arith.cmpf one, %38, %193 : vector<2x256xf32>
    %cst_78 = arith.constant 1.000000e+00 : f32
    %cst_79 = arith.constant 5.000000e-04 : f32
    %195 = vector.broadcast %cst_78 : f32 to vector<2x256xf32>
    %196 = vector.broadcast %cst_79 : f32 to vector<2x256xf32>
    %197 = arith.select %194, %195, %196 : vector<2x256xi1>, vector<2x256xf32>
    %198 = arith.mulf %192, %197 : vector<2x256xf32>
    %cst_80 = arith.constant dense<0.000000e+00> : vector<2xf32>
    %199 = vector.multi_reduction <add>, %198, %cst_80 [1] : vector<2x256xf32> to vector<2xf32>
    %200 = vector.shape_cast %199 : vector<2xf32> to vector<2x1xf32>
    %cst_81 = arith.constant dense<0.000000e+00> : vector<1xf32>
    %201 = vector.multi_reduction <add>, %200, %cst_81 [0] : vector<2x1xf32> to vector<1xf32>
    %202 = vector.shape_cast %201 : vector<1xf32> to vector<1x1xf32>
    %cst_82 = arith.constant 3.906250e-03 : f32
    %203 = vector.broadcast %cst_82 : f32 to vector<1x1xf32>
    %204 = arith.mulf %202, %203 : vector<1x1xf32>
    %205 = vector.extract_strided_slice %30 {offsets = [14, 0], sizes = [2, 256], strides = [1, 1]} : vector<24x256xf32> to vector<2x256xf32>
    %206 = arith.negf %205 : vector<2x256xf32>
    %207 = math.exp %206 : vector<2x256xf32>
    %cst_83 = arith.constant 1.000000e+00 : f32
    %208 = vector.broadcast %cst_83 : f32 to vector<2x256xf32>
    %209 = arith.addf %208, %207 : vector<2x256xf32>
    %210 = arith.divf %208, %209 : vector<2x256xf32>
    %cst_84 = arith.constant 5.000000e-01 : f32
    %211 = vector.broadcast %cst_84 : f32 to vector<2x256xf32>
    %212 = arith.subf %210, %211 : vector<2x256xf32>
    %213 = arith.subf %212, %40 : vector<2x256xf32>
    %214 = math.absf %213 : vector<2x256xf32>
    %cst_85 = arith.constant 0.000000e+00 : f32
    %215 = vector.broadcast %cst_85 : f32 to vector<1x1xf32>
    %216 = vector.extract_strided_slice %36 {offsets = [1, 0], sizes = [1, 256], strides = [1, 1]} : vector<2x256xf32> to vector<1x256xf32>
    %cst_86 = arith.constant dense<0.000000e+00> : vector<1xf32>
    %217 = vector.multi_reduction <add>, %216, %cst_86 [1] : vector<1x256xf32> to vector<1xf32>
    %218 = vector.shape_cast %217 : vector<1xf32> to vector<1x1xf32>
    %cst_87 = arith.constant 3.906250e-03 : f32
    %219 = vector.broadcast %cst_87 : f32 to vector<1x1xf32>
    %220 = arith.mulf %218, %219 : vector<1x1xf32>
    %cst_88 = arith.constant 0.000000e+00 : f32
    %221 = vector.broadcast %cst_88 : f32 to vector<1x1xf32>
    %222 = arith.cmpf oeq, %220, %221 : vector<1x1xf32>
    %cst_89 = arith.constant 1.000000e+00 : f32
    %223 = vector.broadcast %cst_89 : f32 to vector<1x1xf32>
    %224 = arith.select %222, %223, %220 : vector<1x1xi1>, vector<1x1xf32>
    %225 = vector.broadcast %216 : vector<1x256xf32> to vector<2x256xf32>
    %226 = arith.mulf %214, %225 : vector<2x256xf32>
    %cst_90 = arith.constant dense<0.000000e+00> : vector<2xf32>
    %227 = vector.multi_reduction <add>, %226, %cst_90 [1] : vector<2x256xf32> to vector<2xf32>
    %228 = vector.shape_cast %227 : vector<2xf32> to vector<2x1xf32>
    %cst_91 = arith.constant dense<0.000000e+00> : vector<1xf32>
    %229 = vector.multi_reduction <add>, %228, %cst_91 [0] : vector<2x1xf32> to vector<1xf32>
    %230 = vector.shape_cast %229 : vector<1xf32> to vector<1x1xf32>
    %cst_92 = arith.constant 3.906250e-03 : f32
    %231 = vector.broadcast %cst_92 : f32 to vector<1x1xf32>
    %232 = arith.mulf %230, %231 : vector<1x1xf32>
    %233 = arith.divf %232, %224 : vector<1x1xf32>
    %234 = arith.addf %215, %233 : vector<1x1xf32>
    %cst_93 = arith.constant 1.000000e+00 : f32
    %235 = vector.broadcast %cst_93 : f32 to vector<1x1xf32>
    %236 = arith.mulf %175, %235 : vector<1x1xf32>
    %c0_94 = arith.constant 0 : index
    %c1_95 = arith.constant 1 : index
    %c0_96 = arith.constant 0 : index
    %237 = vector.load %arg12[%c0_94, %c1_95, %c0_96] : memref<1x2x4xf32, #tpu.memory_space<vmem>>, vector<1x1x1xf32>
    %238 = vector.shape_cast %237 : vector<1x1x1xf32> to vector<1x1xf32>
    %239 = vector.shape_cast %236 : vector<1x1xf32> to vector<1x1x1xf32>
    tpu.vector_store %arg12[%c0_94, %c1_95, %c0_96], %239 {strides = array<i32>} : memref<1x2x4xf32, #tpu.memory_space<vmem>>, vector<1x1x1xf32>,
    %cst_97 = arith.constant 1.000000e+00 : f32
    %240 = vector.broadcast %cst_97 : f32 to vector<1x1xf32>
    %241 = arith.mulf %178, %240 : vector<1x1xf32>
    %c0_98 = arith.constant 0 : index
    %c1_99 = arith.constant 1 : index
    %c1_100 = arith.constant 1 : index
    %242 = vector.load %arg12[%c0_98, %c1_99, %c1_100] : memref<1x2x4xf32, #tpu.memory_space<vmem>>, vector<1x1x1xf32>
    %243 = vector.shape_cast %242 : vector<1x1x1xf32> to vector<1x1xf32>
    %244 = vector.shape_cast %241 : vector<1x1xf32> to vector<1x1x1xf32>
    tpu.vector_store %arg12[%c0_98, %c1_99, %c1_100], %244 {strides = array<i32>} : memref<1x2x4xf32, #tpu.memory_space<vmem>>, vector<1x1x1xf32>,
    %cst_101 = arith.constant 2.500000e-01 : f32
    %245 = vector.broadcast %cst_101 : f32 to vector<1x1xf32>
    %246 = arith.mulf %204, %245 : vector<1x1xf32>
    %c0_102 = arith.constant 0 : index
    %c1_103 = arith.constant 1 : index
    %c2_104 = arith.constant 2 : index
    %247 = vector.load %arg12[%c0_102, %c1_103, %c2_104] : memref<1x2x4xf32, #tpu.memory_space<vmem>>, vector<1x1x1xf32>
    %248 = vector.shape_cast %247 : vector<1x1x1xf32> to vector<1x1xf32>
    %249 = vector.shape_cast %246 : vector<1x1xf32> to vector<1x1x1xf32>
    tpu.vector_store %arg12[%c0_102, %c1_103, %c2_104], %249 {strides = array<i32>} : memref<1x2x4xf32, #tpu.memory_space<vmem>>, vector<1x1x1xf32>,
    %cst_105 = arith.constant 1.000000e+00 : f32
    %250 = vector.broadcast %cst_105 : f32 to vector<1x1xf32>
    %251 = arith.mulf %234, %250 : vector<1x1xf32>
    %c0_106 = arith.constant 0 : index
    %c1_107 = arith.constant 1 : index
    %c3_108 = arith.constant 3 : index
    %252 = vector.load %arg12[%c0_106, %c1_107, %c3_108] : memref<1x2x4xf32, #tpu.memory_space<vmem>>, vector<1x1x1xf32>
    %253 = vector.shape_cast %252 : vector<1x1x1xf32> to vector<1x1xf32>
    %254 = vector.shape_cast %251 : vector<1x1xf32> to vector<1x1x1xf32>
    tpu.vector_store %arg12[%c0_106, %c1_107, %c3_108], %254 {strides = array<i32>} : memref<1x2x4xf32, #tpu.memory_space<vmem>>, vector<1x1x1xf32>,
    return
  }
  func.func @transform_0(%arg0: i32) -> (i32, i32) {
    %c0_i32 = arith.constant 0 : i32
    %c0_i32_0 = arith.constant 0 : i32
    %c0_i32_1 = arith.constant 0 : i32
    return %c0_i32, %c0_i32_0 : i32, i32
  }
  func.func @transform_1(%arg0: i32) -> (i32, i32) {
    %c0_i32 = arith.constant 0 : i32
    %c0_i32_0 = arith.constant 0 : i32
    %c0_i32_1 = arith.constant 0 : i32
    return %c0_i32, %c0_i32_0 : i32, i32
  }
  func.func @transform_2(%arg0: i32) -> (i32, i32) {
    %c0_i32 = arith.constant 0 : i32
    %c0_i32_0 = arith.constant 0 : i32
    %c0_i32_1 = arith.constant 0 : i32
    return %c0_i32, %c0_i32_0 : i32, i32
  }
  func.func @transform_3(%arg0: i32) -> (i32, i32, i32) {
    %c0_i32 = arith.constant 0 : i32
    %c0_i32_0 = arith.constant 0 : i32
    %c0_i32_1 = arith.constant 0 : i32
    return %arg0, %c0_i32, %c0_i32_0 : i32, i32, i32
  }
  func.func @transform_4(%arg0: i32) -> (i32, i32, i32) {
    %c0_i32 = arith.constant 0 : i32
    %c0_i32_0 = arith.constant 0 : i32
    %c0_i32_1 = arith.constant 0 : i32
    return %arg0, %c0_i32, %c0_i32_0 : i32, i32, i32
  }
  func.func @transform_5(%arg0: i32) -> (i32, i32, i32) {
    %c0_i32 = arith.constant 0 : i32
    %c0_i32_0 = arith.constant 0 : i32
    %c0_i32_1 = arith.constant 0 : i32
    return %arg0, %c0_i32, %c0_i32_0 : i32, i32, i32
  }
  func.func @transform_6(%arg0: i32) -> (i32, i32, i32) {
    %c0_i32 = arith.constant 0 : i32
    %c0_i32_0 = arith.constant 0 : i32
    %c0_i32_1 = arith.constant 0 : i32
    return %arg0, %c0_i32, %c0_i32_0 : i32, i32, i32
  }
  func.func @transform_7(%arg0: i32) -> (i32, i32, i32) {
    %c0_i32 = arith.constant 0 : i32
    %c0_i32_0 = arith.constant 0 : i32
    %c0_i32_1 = arith.constant 0 : i32
    return %arg0, %c0_i32, %c0_i32_0 : i32, i32, i32
  }
  func.func @transform_8(%arg0: i32) -> (i32, i32, i32) {
    %c0_i32 = arith.constant 0 : i32
    %c0_i32_0 = arith.constant 0 : i32
    %c0_i32_1 = arith.constant 0 : i32
    return %arg0, %c0_i32, %c0_i32_0 : i32, i32, i32
  }
  func.func @transform_9(%arg0: i32) -> (i32, i32, i32) {
    %c0_i32 = arith.constant 0 : i32
    %c0_i32_0 = arith.constant 0 : i32
    %c0_i32_1 = arith.constant 0 : i32
    return %arg0, %c0_i32, %c0_i32_0 : i32, i32, i32
  }
  func.func @transform_10(%arg0: i32) -> (i32, i32, i32) {
    %c0_i32 = arith.constant 0 : i32
    %c0_i32_0 = arith.constant 0 : i32
    %c0_i32_1 = arith.constant 0 : i32
    return %arg0, %c0_i32, %c0_i32_0 : i32, i32, i32
  }
  func.func @transform_11(%arg0: i32) -> (i32, i32, i32) {
    %c0_i32 = arith.constant 0 : i32
    %c0_i32_0 = arith.constant 0 : i32
    %c0_i32_1 = arith.constant 0 : i32
    return %arg0, %c0_i32, %c0_i32_0 : i32, i32, i32
  }
}

</mosaic_0001>

<bundles_post_ra>
// kernel: tpu_custom_call.1
= control target key start
LH: loop header
LB: loop body
LE: loop exit
PB: predicated region body
PF: predicated region fallthrough
CT: control target
= control target key end

     0   :  { %s2343_s0 = inlined_call_operand.vmem [shape: bf16[24,4], index: 0, kind: input, shape index: {}]   ;;  %s2344_s1 = inlined_call_operand.vmem [shape: f32[24,1], index: 1, kind: input, shape index: {}]   ;;  %s2345_s2 = inlined_call_operand.vmem [shape: f32[2,1], index: 2, kind: input, shape index: {}]   ;;  %s2346_s3 = inlined_call_operand.vmem [shape: bf16[2,4,256], index: 3, kind: input, shape index: {}]   ;;  %s2347_s4 = inlined_call_operand.vmem [shape: f32[2,2,256], index: 4, kind: input, shape index: {}]   ;;  %s2348_s5 = inlined_call_operand.vmem [shape: f32[2,2,256], index: 5, kind: input, shape index: {}]   ;;  %s2349_s6 = inlined_call_operand.vmem [shape: f32[2,2,256], index: 6, kind: input, shape index: {}]   ;;  %s2350_s7 = inlined_call_operand.hbm [shape: f32[2,2,256], index: 7, kind: output, shape index: {0}]   ;;  %s2351_s8 = inlined_call_operand.hbm [shape: f32[2,2,256], index: 8, kind: output, shape index: {1}]   ;;  %s2352_s9 = inlined_call_operand.hbm [shape: f32[2,2,256], index: 9, kind: output, shape index: {2}]   ;;  %s2353_s10 = inlined_call_operand.hbm [shape: f32[2,8,256], index: 10, kind: output, shape index: {3}]   ;;  %s2354_s11 = inlined_call_operand.hbm [shape: f32[2,2,4], index: 11, kind: output, shape index: {4}]  }
   0x1   :  { %2359 = sst [smem:[#allocation13_spill]] %s2343_s0 }
   0x2   :  { %2360 = sst [smem:[#allocation14_spill]] %s2344_s1 }
   0x3   :  { %2361 = sst [smem:[#allocation15_spill]] %s2345_s2 }
   0x4   :  { %2362 = sst [smem:[#allocation16_spill]] %s2346_s3 }
   0x5   :  { %2363 = sst [smem:[#allocation17_spill]] %s2347_s4 }
   0x6   :  { %2364 = sst [smem:[#allocation18_spill]] %s2348_s5 }
   0x7   :  { %17 = vsyncpa [#allocation3], 0 }
   0x8   :  { %19 = vsyncpa [#allocation3 + $0x1], 0 }
   0x9   :  { %20 = vsyncpa [#allocation5], 0 }
   0xa   :  { %22 = vsyncpa [#allocation5 + $0x1], 0 }
   0xb   :  { %23 = vsyncpa [#allocation8], 0 }
   0xc   :  { %25 = vsyncpa [#allocation8 + $0x1], 0  ;;  %s1848_s17 = smov 0   ;;  %s1850_s18 = smov 0  }
   0xd   :  { %s1852_s19 = smov 0   ;;  %s1854_s20 = smov 0  }
   0xe LB: > { %s1869_s21 = sadd.s32 4294967295, %s1775_s20   ;;  %s2355_s22 = sadd.s32 4294967294, %s1775_s20   ;;  %s1775_s20 = sphi %s1854_s20, %s2386_s20   ;;  %s1771_s19 = sphi %s1852_s19, %s2385_s19   ;;  %s1767_s18 = sphi %s1850_s18, %s2384_s18   ;;  %s1763_s17 = sphi %s1848_s17, %s2383_s17  }
   0xf   : > { %s1873_s23 = sadd.s32 1, %s1775_s20   ;;  %s205_s24 = sadd.s32 1, %s1771_s19 }
  0x10   : > { %s202_s25 = ssub.s32 %s1775_s20, %s1873_s23  ;;  %p215_p0 = scmp.ne.s32.totalorder %s1771_s19, %s1767_s18 }
  0x11   : > { %p203_p1 = scmp.eq.s32.totalorder %s202_s25, 0  ;;  %p216_p2 = scmp.eq.s32.totalorder %s1869_s21, 1 }
  0x12   : > { %p221_p3 = scmp.ne.s32.totalorder %s1767_s18, %s1763_s17  ;;  %p222_p4 = scmp.eq.s32.totalorder %s2355_s22, 1 }
  0x13   : > { %s1886_s26 = scalar_select %p203_p1, %s1771_s19, %s205_s24  }
  0x14   : > { %p1888_p5 = por %p216_p2, %p215_p0  ;;  %p1892_p6 = por %p222_p4, %p221_p3 }
  0x15   : > { %p1395_p7 = scmp.ge.s32.totalorder %s1775_s20, 1  ;;  %p385_p8 = scmp.lt.s32.totalorder %s1775_s20, 3 }
  0x17   : > { %p386_p9 = pnand %p1395_p7, %p385_p8 }
  0x18   : > { %s2367_s0 = sld [smem:[#allocation13_spill]] (!%p386_p9)  ;;  %v1777_v1 = vmov (!%p386_p9), 2   ;;  %v1778_v2 = vmov (!%p386_p9), 0   ;;  %v504_v5 = vlaneseq (!%p386_p9)  ;;  %p460_p10 = scmp.lt.s32.totalorder (!%p386_p9), %s1869_s21, 1  ;;  %v1779_v16 = vmov (!%p386_p9), 3  }
  0x19   : > { %389 = sbr.rel (%p386_p9) target bundleno = 425 (0x1a9), region = 48  ;;  %1527 = vset.pattern.permute.xlu1 (!%p386_p9), %v1777_v1  ;;  %1515 = vset.pattern.permute.xlu0 (!%p386_p9), %v1778_v2  ;;  %s2368_s3 = sld [smem:[#allocation16_spill]] (!%p386_p9)  ;;  %v1780_v17 = vmov (!%p386_p9), 1   ;;  %v1781_v41 = vmov (!%p386_p9), 1983009808   ;;  %vm854_vm0 = vcmask (!%p386_p9), 1041409  }
  0x1a   : > { %v505_v7 = vshrl.u32 (!%p386_p9), %v504_v5, 7  ;;  %s2369_s1 = sld [smem:[#allocation14_spill]] (!%p386_p9)  ;;  %s2370_s2 = sld [smem:[#allocation15_spill]] (!%p386_p9)  ;;  %v714_v42 = vunpack.c.l.s4 (!%p386_p9), %v1781_v41  ;;  %v1782_v50 = vmov (!%p386_p9), 0.0005   ;;  %vm795_vm2 = vcmask (!%p386_p9), 1045508  }
  0x1b   : > { %s2371_s5 = sld [smem:[#allocation18_spill]] (!%p386_p9)  ;;  %s2372_s4 = sld [smem:[#allocation17_spill]] (!%p386_p9)  ;;  %vm873_vm7 = vcmask (!%p386_p9), 1047558   ;;  %vm737_vm8 = vcmask (!%p386_p9), 1043458  }
  0x1c   : > { %v506_v8 = vsub.s32 (!%p386_p9), 0, %v505_v7  ;;  %v510_v9 = vsub.s32 (!%p386_p9), 4, %v505_v7  ;;  %v584_v10 = vsub.s32 (!%p386_p9), 2, %v505_v7  ;;  %v588_v12 = vsub.s32 (!%p386_p9), 6, %v505_v7  ;;  %s1783_s15 = smov (!%p386_p9), [#allocation4]  }
  0x1d   : > { %v1910_v13 = vsub.s32 (!%p386_p9), 1, %v505_v7  ;;  %v546_v14 = vsub.s32 (!%p386_p9), 5, %v505_v7  ;;  %v626_v21 = vsub.s32 (!%p386_p9), 3, %v505_v7  ;;  %v630_v25 = vsub.s32 (!%p386_p9), 7, %v505_v7 }
  0x1e   : > { %v1447_v0 = vld [vmem:[%s2367_s0] sm:$0xff] (!%p386_p9)   ;;  %v482_v39 = vld [vmem:[%s2367_s0 + $0x8] sm:$0xf] (!%p386_p9)  ;;  %v715_v43 = vunpack.c.0.s8 (!%p386_p9), %v714_v42 }
  0x1f   : > { %v1448_v3 = vunpack.c.l.bf16 (!%p386_p9), %v1447_v0  ;;  %v1449_v4 = vunpack.c.h.bf16 (!%p386_p9), %v1447_v0  ;;  %v1946_v40 = vunpack.c.l.bf16 (!%p386_p9), %v482_v39 }
  0x20   : > { %s461_s12 = scalar_select %p460_p10, %s1869_s21, 1  ;;  %v654_v26 = vld [vmem:[%s2369_s1] sm:$0xff]  ;;  %v655_v27 = vld [vmem:[%s2369_s1 + $0x8] sm:$0xff]  ;;  %v1953_v45 = vsub.s32 %v715_v43, %v505_v7 }
  0x21   : > { %v1528_v6 = vpack.i.bf16 %v1449_v4, %v1448_v3  ;;  %v683_v38 = vld [vmem:[%s2370_s2] sm:$0x3] }
  0x22   : > { %s1904_s13 = sshll.u32 %s461_s12, 2 }
  0x23   : > { %1529 = vperm.xlu1 %1527, %v1528_v6   ;;  %1517 = vperm.xlu0 %1515, %v1528_v6   ;;  %s464_s16 = scalar_lea.vmem %s2368_s3, %s1904_s13  ;;  %s474_s29 = scalar_lea.vmem %s2371_s5, %s1904_s13 }
  0x24   : > { %v486_v11 = vld [vmem:[%s464_s16] sm:$0xf]  ;;  %s469_s14 = scalar_lea.vmem %s2372_s4, %s1904_s13  ;;  %s479_s24 = scalar_lea.vmem %s2349_s6, %s1904_s13 }
  0x25   : > { %v487_v15 = vunpack.c.l.bf16 %v486_v11  ;;  %v681_v44 = vld [vmem:[%s474_s29] sm:$0xf]  ;;  %s2062_s13 = sand.u32 1, %s1767_s18   ;;  %s2358_s16 = sand.u32 1, %s1869_s21  }
  0x26   : > { %v1956_v46 = vrot.slane %v681_v44, %v1953_v45  ;;  %v1962_v47 = vld [vmem:[%s469_s14] sm:$0xf]  ;;  %vm780_vm1 = vcmp.ne.f32.partialorder %v681_v44, 0.0  ;;  %s2075_s25 = sshll.u32 %s2062_s13, 2  ;;  %s2145_s2 = scalar_lea.sflag [#allocation5], %s2358_s16 }
  0x27   : > { %1533 = vset.pattern.permute.xlu1 %v1779_v16  ;;  %1521 = vset.pattern.permute.xlu0 %v1780_v17  ;;  %v507_v18 = vrot.slane %v487_v15, %v506_v8  ;;  %v511_v19 = vrot.slane %v487_v15, %v510_v9  ;;  %v585_v20 = vrot.slane %v487_v15, %v584_v10  ;;  %v781_v51 = vsel %vm780_vm1, 1.0, %v1782_v50  ;;  %v1546_v56 = vld [vmem:[%s479_s24] ss:$0 sps:$4 sm:$0xff]   ;;  %s438_s29 = scalar_lea.vmem [#allocation4], %s2075_s25  ;;  %s2356_s30 = scalar_lea.vmem [#allocation6], %s2075_s25 }
  0x28   : > { %1535 = vperm.xlu1 %1533, %v1528_v6   ;;  %1523 = vperm.xlu0 %1521, %v1528_v6   ;;  %v589_v22 = vrot.slane %v487_v15, %v588_v12  ;;  %v543_v23 = vrot.slane %v487_v15, %v1910_v13  ;;  %v547_v24 = vrot.slane %v487_v15, %v546_v14  ;;  %s2357_s12 = scalar_lea.vmem [#allocation2], %s2075_s25  ;;  %s2133_s24 = sshll.u32 %s1869_s21, 6 }
  0x29   : > { %v1920_v28 = vrot.slane %v507_v18, %v506_v8  ;;  %v1922_v29 = vrot.slane %v511_v19, %v506_v8  ;;  %v1924_v30 = vrot.slane %v585_v20, %v584_v10  ;;  %v627_v31 = vrot.slane %v487_v15, %v626_v21  ;;  %s1134_s0 = sshll.u32 %s438_s29, 4  ;;  %s1135_s0 = int_to_ptr.vmem [resolvable:$true] %s1134_s0 }
  0x2a   : > { %v1926_v32 = vrot.slane %v589_v22, %v584_v10  ;;  %v1929_v33 = vrot.slane %v543_v23, %v1910_v13  ;;  %v1932_v34 = vrot.slane %v547_v24, %v1910_v13  ;;  %v631_v35 = vrot.slane %v487_v15, %v630_v25  ;;  %s1593_s14 = scalar_lea.vmem %s1135_s0, 64 }
  0x2b   : > { %v1936_v36 = vrot.slane %v627_v31, %v626_v21  ;;  %v847_v48 = vrot.slane %v1962_v47, %v1910_v13  ;;  %v851_v49 = vrot.slane %v1962_v47, %v626_v21  ;;  %v1968_v52 = vrot.slane %v781_v51, %v1953_v45  ;;  %p1594_p11 = scmp.ne.s32.totalorder %s1135_s0, %s1593_s14 }
  0x2c   : > { %1539 = vset.pattern.permute.xlu1 %v1778_v2  ;;  %1540 = vset.pattern.permute.xlu0 %v1778_v2  ;;  %v1938_v37 = vrot.slane %v631_v35, %v626_v21  ;;  %v1975_v57 = vrot.slane %v1546_v56, %v1953_v45 }
  0x2d   : > { %659 = vperm.xlu1 %1539, %v654_v26   ;;  %664 = vperm.xlu0 %1540, %v655_v27   ;;  %v855_v53 = vsel %vm854_vm0, %v847_v48, 0.0  ;;  %v856_v54 = vsel %vm854_vm0, %v851_v49, 0.0  ;;  %v1978_v58 = vrot.slane %v847_v48, %v1910_v13  ;;  %v1981_v59 = vrot.slane %v851_v49, %v1910_v13  ;;  %p1595_p12 = pnand %p1594_p11, %p1888_p5 }
  0x2e   : > { %v857_v55 = vadd.f32 %v856_v54, %v855_v53 }
  0x2f   : > { %p1596_p13 = pneg %p1595_p12 }
  0x31   : > { %749 = vperm.xlu1 %1539, %v683_v38   ;;  %1541 = vset.pattern.permute.xlu0 %v1780_v17 }
  0x35   : > { %500 = vperm.xlu1 %1539, %v1946_v40  }
  0x39   : > { %1542 = vset.pattern.permute.xlu1 %v1777_v1 }
  0x4c   : > { %858 = vadd.xlane.f32.xlu0 %v857_v55 }
  0xa2   : > { %v1518_v60 = vpop.permute.xlu0 %1517  ;;  %v1530_v61 = vpop.permute.xlu1 %1529 }
  0xa3   : > { %v1520_v62 = vunpack.i.h.bf16 %v1518_v60  ;;  %v1519_v63 = vunpack.i.l.bf16 %v1518_v60  ;;  %v1532_v0 = vunpack.i.h.bf16 %v1530_v61  ;;  %v1531_v1 = vunpack.i.l.bf16 %v1530_v61 }
  0xa5   : > { %v522_v3 = vmul.f32 %v1519_v63, %v1920_v28  ;;  %v523_v4 = vmul.f32 %v1519_v63, %v1922_v29  ;;  %v524_v5 = vmul.f32 %v1520_v62, %v1920_v28  ;;  %v525_v6 = vmul.f32 %v1520_v62, %v1922_v29 }
  0xa6   : > { %v600_v13 = vmul.f32 %v1531_v1, %v1924_v30  ;;  %v601_v14 = vmul.f32 %v1531_v1, %v1926_v32  ;;  %v602_v15 = vmul.f32 %v1532_v0, %v1924_v30  ;;  %v603_v17 = vmul.f32 %v1532_v0, %v1926_v32 }
  0xa7   : > { %v1524_v7 = vpop.permute.xlu0 %1523  ;;  %v1536_v8 = vpop.permute.xlu1 %1535 }
  0xa8   : > { %v1526_v9 = vunpack.i.h.bf16 %v1524_v7  ;;  %v1525_v10 = vunpack.i.l.bf16 %v1524_v7  ;;  %v1538_v11 = vunpack.i.h.bf16 %v1536_v8  ;;  %v1537_v12 = vunpack.i.l.bf16 %v1536_v8 }
  0xaa   : > { %v558_v18 = vmul.f32 %v1525_v10, %v1929_v33  ;;  %v559_v19 = vmul.f32 %v1525_v10, %v1932_v34  ;;  %v560_v20 = vmul.f32 %v1526_v9, %v1929_v33  ;;  %v561_v21 = vmul.f32 %v1526_v9, %v1932_v34 }
  0xab   : > { %v642_v22 = vmul.f32 %v1537_v12, %v1936_v36  ;;  %v643_v23 = vmul.f32 %v1537_v12, %v1938_v37  ;;  %v644_v24 = vmul.f32 %v1538_v11, %v1936_v36  ;;  %v645_v25 = vmul.f32 %v1538_v11, %v1938_v37 }
  0xac   : > { %v564_v26 = vadd.f32 %v558_v18, %v522_v3  ;;  %v565_v27 = vadd.f32 %v559_v19, %v523_v4  ;;  %v566_v31 = vadd.f32 %v560_v20, %v524_v5  ;;  %v567_v35 = vadd.f32 %v561_v21, %v525_v6  ;;  %v665_v43 = vpop.permute.xlu0 %664  ;;  %v660_v51 = vpop.permute.xlu1 %659 }
  0xad   : > { %v763_v12 = vcombine.low %v1956_v46, %v1956_v46  ;;  %v2016_v18 = vcombine.low %v1968_v52, %v1968_v52 }
  0xae   : > { %v606_v38 = vadd.f32 %v600_v13, %v564_v26  ;;  %v607_v39 = vadd.f32 %v601_v14, %v565_v27  ;;  %v608_v41 = vadd.f32 %v602_v15, %v566_v31  ;;  %v609_v42 = vadd.f32 %v603_v17, %v567_v35 }
  0xb0   : > { %v648_v44 = vadd.f32 %v642_v22, %v606_v38  ;;  %v649_v48 = vadd.f32 %v643_v23, %v607_v39  ;;  %v650_v49 = vadd.f32 %v644_v24, %v608_v41  ;;  %v651_v50 = vadd.f32 %v645_v25, %v609_v42  ;;  %v750_v17 = vpop.permute.xlu1 %749 }
  0xb1   : > { %v751_v22 = vrot.slane %v750_v17, 4  ;;  %v2029_v41 = vcombine.low %v1975_v57, %v1975_v57 }
  0xb2   : > { %v672_v53 = vadd.f32 %v660_v51, %v648_v44  ;;  %v673_v54 = vadd.f32 %v660_v51, %v649_v48  ;;  %v674_v55 = vadd.f32 %v665_v43, %v650_v49  ;;  %v675_v56 = vadd.f32 %v665_v43, %v651_v50 }
  0xb4   : > { %v686_v60 = vrot.slane %v672_v53, 6  ;;  %v687_v61 = vrot.slane %v673_v54, 6  ;;  %1547 = vtanh.f32 %v672_v53  ;;  %v1411_v62 = vmul.f32 -1.442695, %v672_v53 }
  0xb5   : > { %1549 = vtanh.f32 %v673_v54  ;;  %v1412_v63 = vmul.f32 -1.442695, %v673_v54  ;;  %v948_v0 = vrot.slane %v674_v55, 6  ;;  %v949_v1 = vrot.slane %v675_v56, 6 }
  0xb6   : > { %1551 = vpow2.f32 %v1411_v62  ;;  %v1418_v3 = vmul.f32 -1.442695, %v674_v55  ;;  %v1999_v4 = vsub.f32 %v672_v53, %v686_v60  ;;  %v2005_v7 = vsub.f32 %v673_v54, %v687_v61 }
  0xb7   : > { %1553 = vpow2.f32 %v1412_v63  ;;  %v2001_v5 = vsub.f32 %v674_v55, %v948_v0  ;;  %v2003_v6 = vsub.f32 %v675_v56, %v949_v1  ;;  %v1419_v10 = vmul.f32 -1.442695, %v675_v56 }
  0xb8   : > { %1555 = vtanh.f32 %v674_v55  ;;  %v694_v15 = vand.u32 2147483647, %v1999_v4  ;;  %v695_v20 = vand.u32 2147483647, %v2005_v7  ;;  %v712_v21 = vcombine.low %v1999_v4, %v2005_v7 }
  0xb9   : > { %v956_v8 = vand.u32 2147483647, %v2001_v5  ;;  %v957_v9 = vand.u32 2147483647, %v2003_v6  ;;  %1557 = vtanh.f32 %v675_v56  ;;  %v974_v11 = vcombine.low %v2001_v5, %v2003_v6 }
  0xba   : > { %1559 = vpow2.f32 %v1418_v3  ;;  %v696_v25 = vsub.f32 0.0, %v694_v15  ;;  %v697_v31 = vsub.f32 0.0, %v695_v20  ;;  %v2023_v35 = vrot.slane %v712_v21, %v1953_v45 }
  0xbb   : > { %v958_v13 = vsub.f32 0.0, %v956_v8  ;;  %v959_v14 = vsub.f32 0.0, %v957_v9  ;;  %v981_v19 = vrot.slane %v974_v11, %v1953_v45  ;;  %1561 = vpow2.f32 %v1419_v10 }
  0xbc   : > { %v698_v42 = vmul.f32 1.442695, %v696_v25  ;;  %v700_v49 = vmul.f32 1.442695, %v697_v31  ;;  %v720_v54 = vcombine.high %v2023_v35, %v2023_v35 }
  0xbd   : > { %v960_v23 = vmul.f32 1.442695, %v958_v13  ;;  %v962_v24 = vmul.f32 1.442695, %v959_v14  ;;  %v982_v27 = vcombine.high %v981_v19, %v981_v19 }
  0xbe   : > { %v1548_v26 = vpop.eup %1547 }
  0xbf   : > { %v1550_v38 = vpop.eup %1549  ;;  %v2025_v39 = vmul.f32 %v1548_v26, %v751_v22  ;;  %1563 = vpow2.f32 %v960_v23  ;;  %v2034_v48 = vmul.f32 %v982_v27, %v1962_v47 }
  0xc0   : > { %v1552_v43 = vpop.eup %1551  ;;  %v2031_v44 = vmul.f32 %v1550_v38, %v751_v22  ;;  %1565 = vpow2.f32 %v962_v24 }
  0xc1   : > { %v1554_v50 = vpop.eup %1553  ;;  %v766_v51 = vsub.f32 %v2025_v39, %v763_v12  ;;  %v819_v53 = vadd.f32 1.0, %v1552_v43  ;;  %1567 = vpow2.f32 %v698_v42  ;;  %v986_v61 = vcombine.low %v2034_v48, %v2034_v48 }
  0xc2   : > { %v1556_v55 = vpop.eup %1555  ;;  %v767_v56 = vsub.f32 %v2031_v44, %v1956_v46  ;;  %v820_v60 = vadd.f32 1.0, %v1554_v50  ;;  %1569 = vpow2.f32 %v700_v49 }
  0xc3   : > { %v1558_v62 = vpop.eup %1557  ;;  %v1008_v63 = vmul.f32 %v1556_v55, %v751_v22  ;;  %v768_v0 = vand.u32 2147483647, %v766_v51  ;;  %v772_v1 = vmul.f32 0.5, %v766_v51  ;;  %1571 = vrcp.f32 %v819_v53 }
  0xc4   : > { %v1560_v3 = vpop.eup %1559  ;;  %v1009_v8 = vmul.f32 %v1558_v62, %v751_v22  ;;  %v769_v9 = vand.u32 2147483647, %v767_v56  ;;  %v773_v10 = vmul.f32 0.5, %v767_v56  ;;  %1573 = vrcp.f32 %v820_v60 }
  0xc5   : > { %v1010_v11 = vsub.f32 %v1008_v63, %v763_v12  ;;  %vm770_vm3 = vcmp.lt.f32.partialorder %v768_v0, 1.0  ;;  %v774_v13 = vmul.f32 %v772_v1, %v766_v51  ;;  %v1409_v14 = vadd.f32 -0.5, %v768_v0  ;;  %v1562_v22 = vpop.eup %1561 }
  0xc6   : > { %v1011_v15 = vsub.f32 %v1009_v8, %v1956_v46  ;;  %vm2044_vm4 = vcmp.lt.f32.partialorder %v769_v9, 1.0  ;;  %v775_v19 = vmul.f32 %v773_v10, %v767_v56  ;;  %v1410_v20 = vadd.f32 -0.5, %v769_v9 }
  0xc7   : > { %v1012_v21 = vand.u32 2147483647, %v1010_v11  ;;  %v1016_v23 = vmul.f32 0.5, %v1010_v11  ;;  %v778_v24 = vsel %vm770_vm3, %v774_v13, %v1409_v14  ;;  %v1048_v25 = vadd.f32 1.0, %v1560_v3 }
  0xc8   : > { %v1013_v26 = vand.u32 2147483647, %v1011_v15  ;;  %v1017_v27 = vmul.f32 0.5, %v1011_v15  ;;  %v779_v12 = vsel %vm2044_vm4, %v775_v19, %v1410_v20  ;;  %v793_v31 = vmul.f32 %v2016_v18, %v778_v24 }
  0xc9   : > { %v1564_v46 = vpop.eup %1563  ;;  %vm2051_vm5 = vcmp.lt.f32.partialorder %v1012_v21, 1.0  ;;  %v1018_v42 = vmul.f32 %v1016_v23, %v1010_v11  ;;  %v1416_v43 = vadd.f32 -0.5, %v1012_v21  ;;  %v794_v48 = vmul.f32 %v1968_v52, %v779_v12 }
  0xca   : > { %v1566_v49 = vpop.eup %1565  ;;  %vm2056_vm6 = vcmp.lt.f32.partialorder %v1013_v26, 1.0  ;;  %v1019_v51 = vmul.f32 %v1017_v27, %v1011_v15  ;;  %v1417_v53 = vadd.f32 -0.5, %v1013_v26  ;;  %v796_v55 = vsel %vm795_vm2, %v793_v31, 0.0 }
  0xcb   : > { %v1568_v56 = vpop.eup %1567  ;;  %v1022_v60 = vsel %vm2051_vm5, %v1018_v42, %v1416_v43  ;;  %v797_v62 = vsel %vm795_vm2, %v794_v48, 0.0  ;;  %v1049_v63 = vadd.f32 1.0, %v1562_v22  ;;  %1575 = vrcp.f32 %v1048_v25 }
  0xcc   : > { %v1570_v0 = vpop.eup %1569  ;;  %v1023_v1 = vsel %vm2056_vm6, %v1019_v51, %v1417_v53  ;;  %v1024_v3 = vmul.f32 %v1022_v60, %v2016_v18  ;;  %v798_v8 = vadd.f32 %v797_v62, %v796_v55  ;;  %v964_v9 = vadd.f32 1.0, %v1564_v46 }
  0xcd   : > { %v1572_v10 = vpop.eup %1571  ;;  %v1025_v11 = vmul.f32 %v1023_v1, %v1968_v52  ;;  %1577 = vrcp.f32 %v1049_v63  ;;  %v965_v13 = vadd.f32 1.0, %v1566_v49  ;;  %v2072_v14 = vrot.slane %v986_v61, %v1953_v45 }
  0xce   : > { %v1574_v15 = vpop.eup %1573  ;;  %v1026_v17 = vsel %vm795_vm2, %v1024_v3, 0.0  ;;  %799 = vadd.xlane.f32.xlu1 %v798_v8  ;;  %v1413_v19 = vadd.f32 -0.5, %v1572_v10  ;;  %1579 = vlog2.f32 %v964_v9  ;;  %v702_v20 = vadd.f32 1.0, %v1568_v56 }
  0xcf   : > { %v1027_v18 = vsel %vm795_vm2, %v1025_v11, 0.0  ;;  %v1414_v21 = vadd.f32 -0.5, %v1574_v15  ;;  %1581 = vlog2.f32 %v965_v13  ;;  %v703_v61 = vadd.f32 1.0, %v1570_v0 }
  0xd0   : > { %v1028_v52 = vadd.f32 %v1027_v18, %v1026_v17  ;;  %v839_v23 = vsub.f32 %v1413_v19, %v2029_v41  ;;  %1583 = vlog2.f32 %v702_v20  ;;  %v722_v25 = vmul.f32 %v720_v54, %v1962_v47 }
  0xd1   : > { %v840_v24 = vsub.f32 %v1414_v21, %v1975_v57  ;;  %v914_v22 = vcombine.high %v2025_v39, %v2031_v44  ;;  %v926_v26 = vcombine.high %v1413_v19, %v1414_v21  ;;  %1585 = vlog2.f32 %v703_v61 }
  0xd2   : > { %1029 = vadd.xlane.f32.xlu0 %v1028_v52  ;;  %v841_v27 = vand.u32 2147483647, %v839_v23  ;;  %v724_v31 = vcombine.low %v722_v25, %v722_v25  ;;  %v954_v56 = vmax.f32 %v2001_v5, 0.0  ;;  %v955_v1 = vmax.f32 %v2003_v6, 0.0 }
  0xd3   : > { %v842_v12 = vand.u32 2147483647, %v840_v24  ;;  %1415 = vst.sshfl [vmem:[%s438_s29] sm:$0x33 pattern:$0x76325410] %v914_v22  ;;  %v933_v46 = vrot.slane %v926_v26, %v1953_v45  ;;  %v692_v9 = vmax.f32 %v1999_v4, 0.0  ;;  %v994_v5 = vcombine.high %v2072_v14, %v2072_v14 }
  0xd4   : > { %v871_v35 = vmul.f32 %v1978_v58, %v841_v27  ;;  %v731_v39 = vrot.slane %v724_v31, %v1953_v45 }
  0xd5   : > { %v1576_v47 = vpop.eup %1575  ;;  %v872_v54 = vmul.f32 %v1981_v59, %v842_v12  ;;  %v934_v44 = vcombine.high %v933_v46, %v933_v46 }
  0xd6   : > { %v874_v38 = vsel %vm873_vm7, %v871_v35, 0.0  ;;  %v1420_v42 = vadd.f32 -0.5, %v1576_v47  ;;  %v732_v52 = vcombine.high %v731_v39, %v731_v39 }
  0xd7   : > { %v1578_v43 = vpop.eup %1577  ;;  %v875_v48 = vsel %vm873_vm7, %v872_v54, 0.0  ;;  %936 = vst [vmem:[%s2356_s30] sm:$0xf] %v934_v44 }
  0xd8   : > { %v1580_v49 = vpop.eup %1579  ;;  %v876_v50 = vadd.f32 %v875_v48, %v874_v38  ;;  %v1421_v51 = vadd.f32 -0.5, %v1578_v43  ;;  %v1056_v53 = vsub.f32 %v1420_v42, %v2029_v41 }
  0xd9   : > { %v1582_v55 = vpop.eup %1581  ;;  %v967_v60 = vmul.f32 0.6931472, %v1580_v49 }
  0xda   : > { %v1584_v62 = vpop.eup %1583  ;;  %877 = vadd.xlane.f32.xlu0 %v876_v50  ;;  %v1057_v63 = vsub.f32 %v1421_v51, %v1975_v57  ;;  %v1058_v0 = vand.u32 2147483647, %v1056_v53  ;;  %v969_v3 = vmul.f32 0.6931472, %v1582_v55  ;;  %v693_v57 = vmax.f32 %v2005_v7, 0.0 }
  0xdb   : > { %v970_v8 = vadd.f32 %v967_v60, %v954_v56  ;;  %v705_v10 = vmul.f32 0.6931472, %v1584_v62  ;;  %v1586_v11 = vpop.eup %1585 }
  0xdc   : > { %v1059_v13 = vand.u32 2147483647, %v1057_v63  ;;  %v1060_v41 = vmul.f32 %v1058_v0, %v1978_v58  ;;  %v971_v15 = vadd.f32 %v969_v3, %v955_v1  ;;  %v707_v19 = vmul.f32 0.6931472, %v1586_v11 }
  0xdd   : > { %v997_v17 = vsub.f32 %v970_v8, %v2072_v14  ;;  %v708_v6 = vadd.f32 %v705_v10, %v692_v9 }
  0xde   : > { %v1061_v20 = vmul.f32 %v1059_v13, %v1981_v59  ;;  %v1062_v18 = vsel %vm873_vm7, %v1060_v41, 0.0  ;;  %v998_v21 = vsub.f32 %v971_v15, %v994_v5  ;;  %v709_v61 = vadd.f32 %v707_v19, %v693_v57 }
  0xdf   : > { %v999_v23 = vsel %vm737_vm8, %v997_v17, 0.0  ;;  %v735_v58 = vsub.f32 %v708_v6, %v731_v39  ;;  %v893_v24 = vsub.f32 %v1999_v4, %v708_v6 }
  0xe0   : > { %v1063_v25 = vsel %vm873_vm7, %v1061_v20, 0.0  ;;  %v1000_v14 = vsel %vm737_vm8, %v998_v21, 0.0  ;;  %v736_v27 = vsub.f32 %v709_v61, %v732_v52  ;;  %v894_v59 = vsub.f32 %v2005_v7, %v709_v61 }
  0xe1   : > { %v1064_v22 = vadd.f32 %v1063_v25, %v1062_v18  ;;  %v1001_v26 = vadd.f32 %v1000_v14, %v999_v23  ;;  %v738_v12 = vsel %vm737_vm8, %v735_v58, 0.0  ;;  %v895_v31 = vmul.f32 1.442695, %v893_v24 }
  0xe2   : > { %v739_v46 = vsel %vm737_vm8, %v736_v27, 0.0  ;;  %v897_v4 = vmul.f32 1.442695, %v894_v59 }
  0xe3   : > { %1065 = vadd.xlane.f32.xlu1 %v1064_v22  ;;  %1002 = vadd.xlane.f32.xlu0 %v1001_v26  ;;  %v740_v35 = vadd.f32 %v739_v46, %v738_v12  ;;  %1587 = vpow2.f32 %v895_v31 }
  0xe4   : > { %1589 = vpow2.f32 %v897_v4 }
  0xe7   : > { %741 = vadd.xlane.f32.xlu1 %v740_v35 }
  0xed   : > { %v1588_v47 = vpop.eup %1587 }
  0xee   : > { %v1590_v54 = vpop.eup %1589 }
  0xef   : > { %v901_v39 = vcombine.low %v1588_v47, %v1590_v54 }
  0xf1   : > { %v908_v44 = vrot.slane %v901_v39, %v1953_v45  ;;  %v656_v45 = vld [vmem:[%s2369_s1 + $0x10] sm:$0xff]  ;;  %s1597_s1 = sshll.u32 %s1783_s15, 4  ;;  %s1598_s1 = int_to_ptr.vmem [resolvable:$false] %s1597_s1 }
  0xf2   : > { %s1599_s3 = scalar_lea.vmem %s1598_s1, 128  ;;  %p1600_p0 = scmp.lt.s32.totalorder %s1135_s0, %s1598_s1 }
  0xf3   : > { %v909_v7 = vcombine.high %v908_v44, %v908_v44  ;;  %p1601_p1 = scmp.lt.s32.totalorder %s1599_s3, %s1593_s14 }
  0xf5   : > { %911 = vst [vmem:[%s2357_s12] sm:$0xf] %v909_v7  ;;  %s2139_s12 = scalar_lea.hbm %s2351_s8, %s2133_s24  ;;  %p1602_p2 = por %p1601_p1, %p1600_p0 }
  0xf7   : > { %p1603_p3 = pnand %p1602_p2, %p1596_p13 }
  0xf8   : > { %579 = vperm.xlu1 %1542, %v1946_v40  }
  0xf9   : > { %537 = vperm.xlu0 %1541, %v1946_v40  }
  0xfc   : > { %1543 = vset.pattern.permute.xlu1 %v1779_v16 }
  0xfd   : > { %621 = vperm.xlu1 %1543, %v1946_v40   ;;  %1545 = vset.pattern.permute.xlu0 %v1778_v2 }
 0x101   : > { %1544 = vset.pattern.permute.xlu1 %v1778_v2 }
 0x102   : > { %669 = vperm.xlu1 %1544, %v656_v45  }
 0x103   : > { %1606 = shalt.err (!%p1603_p3)
}
 0x104   : > { %s1607_s22 = scalar_lea.hbm %s2139_s12, 64  ;;  %s1611_s15 = scalar_lea.hbm %s2351_s8, 128 }
 0x105   : > { %p1608_p4 = scmp.ne.s32.totalorder %s2139_s12, %s1607_s22  ;;  %p1612_p9 = scmp.lt.u32.totalorder %s2139_s12, %s2351_s8 }
 0x106   : > { %p1613_p10 = scmp.lt.u32.totalorder %s1611_s15, %s1607_s22  ;;  %p1615_p12 = scmp.lt.u32.totalorder %s1607_s22, %s2139_s12 }
 0x107   : > { %p1609_p7 = pnand %p1608_p4, %p1888_p5 }
 0x108   : > { %p1614_p11 = por %p1613_p10, %p1612_p9 }
 0x109   : > { %p1610_p8 = pneg %p1609_p7 }
 0x10a   : > { %p1616_p13 = por %p1615_p12, %p1614_p11 }
 0x10c   : > { %p1617_p0 = pnand %p1616_p13, %p1610_p8 }
 0x10e   : > { %1620 = shalt.err (!%p1617_p0)
}
 0x10f   : > { %1451 = dma.vmem_to_hbm [thread:$0]  (%p1888_p5), %s1135_s0, 64, %s2139_s12, %s2145_s2  }
 0x110   : > { %s2169_s16 = scalar_lea.hbm %s2350_s7, %s2133_s24  ;;  %s2379_s29 = scalar_lea.vmem [#allocation2], %s2075_s25 }
 0x111   : > { %s1120_s22 = sshll.u32 %s2379_s29, 4  ;;  %s2179_s1 = scalar_lea.hbm %s2352_s9, %s2133_s24  ;;  %s2173_s22 = int_to_ptr.vmem [resolvable:$true] %s1120_s22 }
 0x112   : > { %s1086_s4 = scalar_lea.sflag [#allocation3], %s2062_s13  ;;  %s1621_s5 = scalar_lea.vmem %s2173_s22, 64 }
 0x113   : > { %p1622_p1 = scmp.ne.s32.totalorder %s2173_s22, %s1621_s5  ;;  %s1784_s0 = smov [#allocation2]  }
 0x114   : > { %s1625_s12 = sshll.u32 %s1784_s0, 4  ;;  %s1626_s12 = int_to_ptr.vmem [resolvable:$false] %s1625_s12 }
 0x115   : > { %p1623_p2 = pnand %p1622_p1, %p1888_p5  ;;  %s1627_s3 = scalar_lea.vmem %s1626_s12, 128 }
 0x116   : > { %p1628_p4 = scmp.lt.s32.totalorder %s2173_s22, %s1626_s12  ;;  %p1629_p7 = scmp.lt.s32.totalorder %s1627_s3, %s1621_s5 }
 0x117   : > { %p1624_p3 = pneg %p1623_p2 }
 0x118   : > { %p1630_p8 = por %p1629_p7, %p1628_p4 }
 0x11a   : > { %p1631_p9 = pnand %p1630_p8, %p1624_p3 }
 0x11c   : > { %1634 = shalt.err (!%p1631_p9)
}
 0x11d   : > { %s1635_s24 = scalar_lea.hbm %s2169_s16, 64  ;;  %s1639_s30 = scalar_lea.hbm %s2350_s7, 128 }
 0x11e   : > { %p1636_p10 = scmp.ne.s32.totalorder %s2169_s16, %s1635_s24  ;;  %p1640_p13 = scmp.lt.u32.totalorder %s2169_s16, %s2350_s7 }
 0x11f   : > { %p1641_p0 = scmp.lt.u32.totalorder %s1639_s30, %s1635_s24  ;;  %p1643_p2 = scmp.lt.u32.totalorder %s1635_s24, %s2169_s16 }
 0x120   : > { %p1637_p11 = pnand %p1636_p10, %p1888_p5 }
 0x121   : > { %p1642_p1 = por %p1641_p0, %p1640_p13 }
 0x122   : > { %p1638_p12 = pneg %p1637_p11 }
 0x123   : > { %p1644_p3 = por %p1643_p2, %p1642_p1 }
 0x125   : > { %p1645_p4 = pnand %p1644_p3, %p1638_p12 }
 0x127   : > { %1648 = shalt.err (!%p1645_p4)
}
 0x128   : > { %1450 = dma.vmem_to_hbm [thread:$0]  (%p1888_p5), %s2173_s22, 64, %s2169_s16, %s1086_s4  }
 0x129   : > { %s2380_s5 = scalar_lea.vmem [#allocation6], %s2075_s25  ;;  %s1785_s14 = smov [#allocation6]  }
 0x12a   : > { %s1148_s12 = sshll.u32 %s2380_s5, 4  ;;  %s1653_s24 = sshll.u32 %s1785_s14, 4  ;;  %s1149_s12 = int_to_ptr.vmem [resolvable:$true] %s1148_s12  ;;  %s1654_s24 = int_to_ptr.vmem [resolvable:$false] %s1653_s24 }
 0x12b   : > { %s1649_s3 = scalar_lea.vmem %s1149_s12, 64  ;;  %s1655_s29 = scalar_lea.vmem %s1654_s24, 128 }
 0x12c   : > { %p1650_p7 = scmp.ne.s32.totalorder %s1149_s12, %s1649_s3  ;;  %p1656_p10 = scmp.lt.s32.totalorder %s1149_s12, %s1654_s24 }
 0x12d   : > { %p1657_p11 = scmp.lt.s32.totalorder %s1655_s29, %s1649_s3 }
 0x12e   : > { %p1651_p8 = pnand %p1650_p7, %p1888_p5 }
 0x12f   : > { %p1658_p12 = por %p1657_p11, %p1656_p10 }
 0x130   : > { %p1652_p9 = pneg %p1651_p8 }
 0x132   : > { %p1659_p13 = pnand %p1658_p12, %p1652_p9 }
 0x134   : > { %1662 = shalt.err (!%p1659_p13)
}
 0x135   : > { %s1663_s4 = scalar_lea.hbm %s2179_s1, 64  ;;  %s1667_s22 = scalar_lea.hbm %s2352_s9, 128 }
 0x136   : > { %p1664_p0 = scmp.ne.s32.totalorder %s2179_s1, %s1663_s4  ;;  %p1668_p3 = scmp.lt.u32.totalorder %s2179_s1, %s2352_s9 }
 0x137   : > { %p1669_p4 = scmp.lt.u32.totalorder %s1667_s22, %s1663_s4  ;;  %p1671_p8 = scmp.lt.u32.totalorder %s1663_s4, %s2179_s1 }
 0x138   : > { %p1665_p1 = pnand %p1664_p0, %p1888_p5 }
 0x139   : > { %p1670_p7 = por %p1669_p4, %p1668_p3 }
 0x13a   : > { %p1666_p2 = pneg %p1665_p1 }
 0x13b   : > { %p1672_p9 = por %p1671_p8, %p1670_p7 }
 0x13d   : > { %p1673_p10 = pnand %p1672_p9, %p1666_p2 }
 0x13f   : > { %1676 = shalt.err (!%p1673_p10)
}
 0x140   : > { %1452 = dma.vmem_to_hbm [thread:$0]  (%p1888_p5), %s1149_s12, 64, %s2179_s1, %s2145_s2   ;;  %v2223_v2 = vpop.permute.xlu1 %500  ;;  %v859_v16 = vpop.xlane.xlu0 %858  ;;  %vm804_vm9 = vcmask 1041408   ;;  %vm937_vm11 = vcmask 2050   ;;  %vm939_vm12 = vcmask 11275   ;;  %vm942_vm13 = vcmask 16400  }
 0x141   : > { %v860_v56 = vmul.f32 0.00390625, %v859_v16  ;;  %s1400_s2 = sshll.u32 %s2062_s13, 1  ;;  %vm944_vm14 = vcmask 25625   ;;  %v526_v4 = vmul.f32 %v1920_v28, %v2223_v2  ;;  %s1399_s0 = sshll.u32 %s2062_s13, 4  ;;  %v527_v39 = vmul.f32 %v1922_v29, %v2223_v2 }
 0x142   : > { %s2230_s1 = scalar_lea.vmem [#allocation9], %s1400_s2  ;;  %s1445_s13 = sshll.u32 %s1869_s21, 8 }
 0x143   : > { %vm861_vm10 = vcmp.eq.f32.partialorder %v860_v56, 0.0  ;;  %s452_s5 = scalar_lea.vmem [#allocation7], %s1399_s0  ;;  %s1435_s3 = sshll.u32 %s1869_s21, 5 }
 0x144   : > { %v862_v9 = vsel %vm861_vm10, 1.0, %v860_v56  ;;  %s1162_s12 = sshll.u32 %s452_s5, 4  ;;  %s1175_s14 = sshll.u32 %s2230_s1, 4  ;;  %s2265_s12 = int_to_ptr.vmem [resolvable:$true] %s1162_s12  ;;  %s2272_s14 = int_to_ptr.vmem [resolvable:$true] %s1175_s14 }
 0x145   : > { %1591 = vrcp.f32 %v862_v9  ;;  %s2263_s4 = scalar_lea.hbm %s2353_s10, %s1445_s13  ;;  %s2270_s22 = scalar_lea.hbm %s2354_s11, %s1435_s3 }
 0x146   : > { %s2381_s30 = sand.u32 1, %s1869_s21   ;;  %s1677_s2 = scalar_lea.vmem %s2265_s12, 256 }
 0x147   : > { %s2278_s15 = scalar_lea.sflag [#allocation8], %s2381_s30  ;;  %p1678_p11 = scmp.ne.s32.totalorder %s2265_s12, %s1677_s2 }
 0x148   : > { %s1786_s0 = smov [#allocation7]  }
 0x149   : > { %p1679_p12 = pnand %p1678_p11, %p1888_p5  ;;  %s1681_s13 = sshll.u32 %s1786_s0, 4  ;;  %s1682_s13 = int_to_ptr.vmem [resolvable:$false] %s1681_s13 }
 0x14a   : > { %s1683_s24 = scalar_lea.vmem %s1682_s13, 512  ;;  %p1684_p0 = scmp.lt.s32.totalorder %s2265_s12, %s1682_s13 }
 0x14b   : > { %p1680_p13 = pneg %p1679_p12  ;;  %p1685_p1 = scmp.lt.s32.totalorder %s1683_s24, %s1677_s2 }
 0x14d   : > { %p1686_p2 = por %p1685_p1, %p1684_p0 }
 0x14f   : > { %v1592_v59 = vpop.eup %1591  ;;  %p1687_p3 = pnand %p1686_p2, %p1680_p13 }
 0x15b   : > { %v800_v40 = vpop.xlane.xlu1 %799 }
 0x15c   : > { %v802_v38 = vrot.slane %v800_v40, 4 }
 0x15e   : > { %v805_v42 = vsel %vm804_vm9, %v802_v38, 0.0 }
 0x15f   : > { %v1030_v43 = vpop.xlane.xlu0 %1029  ;;  %v806_v48 = vrot.slane %v805_v42, 4 }
 0x160   : > { %v1032_v49 = vrot.slane %v1030_v43, 4 }
 0x161   : > { %v807_v50 = vadd.f32 %v806_v48, %v805_v42 }
 0x162   : > { %v1034_v51 = vsel %vm804_vm9, %v1032_v49, 0.0 }
 0x163   : > { %v1035_v53 = vrot.slane %v1034_v51, 4  ;;  %v808_v55 = vrot.slane %v807_v50, 2 }
 0x165   : > { %v1036_v60 = vadd.f32 %v1035_v53, %v1034_v51  ;;  %v809_v63 = vadd.f32 %v808_v55, %v807_v50 }
 0x167   : > { %v1037_v62 = vrot.slane %v1036_v60, 2  ;;  %v878_v0 = vpop.xlane.xlu0 %877  ;;  %v810_v11 = vrot.slane %v809_v63, 1 }
 0x168   : > { %v880_v1 = vrot.slane %v878_v0, 6 }
 0x169   : > { %v1038_v3 = vadd.f32 %v1037_v62, %v1036_v60  ;;  %v811_v17 = vadd.f32 %v810_v11, %v809_v63 }
 0x16a   : > { %v882_v8 = vsel %vm804_vm9, %v880_v1, 0.0 }
 0x16b   : > { %v1039_v10 = vrot.slane %v1038_v3, 1  ;;  %v883_v13 = vrot.slane %v882_v8, 4  ;;  %v812_v23 = vmul.f32 0.00390625, %v811_v17 }
 0x16d   : > { %v1040_v41 = vadd.f32 %v1039_v10, %v1038_v3  ;;  %v884_v15 = vadd.f32 %v883_v13, %v882_v8  ;;  %v941_v27 = vmul.f32 0.25, %v812_v23 }
 0x16f   : > { %v1041_v5 = vmul.f32 0.00390625, %v1040_v41  ;;  %v885_v57 = vrot.slane %v884_v15, 2 }
 0x170   : > { %v1066_v19 = vpop.xlane.xlu1 %1065  ;;  %v1003_v6 = vpop.xlane.xlu0 %1002 }
 0x171   : > { %v886_v20 = vadd.f32 %v885_v57, %v884_v15  ;;  %v1068_v18 = vrot.slane %v1066_v19, 6  ;;  %v1004_v21 = vmul.f32 0.00390625, %v1003_v6  ;;  %v1082_v52 = vmul.f32 0.25, %v1041_v5 }
 0x173   : > { %v887_v61 = vrot.slane %v886_v20, 1  ;;  %v1070_v58 = vsel %vm804_vm9, %v1068_v18, 0.0  ;;  %1080 = vst.msk [vmem:[%s2230_s1 - $0x1] sm:$0x4] %vm937_vm11, %v1004_v21 }
 0x174   : > { %v1071_v24 = vrot.slane %v1070_v58, 4  ;;  %1081 = vst.msk [vmem:[%s2230_s1 - $0x2] sm:$0x8] %vm939_vm12, %v1004_v21  ;;  %v742_v25 = vpop.xlane.xlu1 %741 }
 0x175   : > { %v888_v14 = vadd.f32 %v887_v61, %v886_v20  ;;  %v743_v22 = vmul.f32 0.00390625, %v742_v25  ;;  %1083 = vst.msk [vmem:[%s2230_s1 + $0x1] sm:$0x1] %vm942_vm13, %v1082_v52 }
 0x176   : > { %v1072_v26 = vadd.f32 %v1071_v24, %v1070_v58 }
 0x177   : > { %v889_v12 = vmul.f32 0.00390625, %v888_v14  ;;  %938 = vst.msk [vmem:[%s2230_s1 - $0x2] sm:$0x4] %vm937_vm11, %v743_v22 }
 0x178   : > { %v1073_v31 = vrot.slane %v1072_v26, 2  ;;  %940 = vst.msk [vmem:[%s2230_s1 - $0x3] sm:$0x8] %vm939_vm12, %v743_v22  ;;  %v580_v46 = vpop.permute.xlu1 %579  ;;  %v538_v35 = vpop.permute.xlu0 %537 }
 0x179   : > { %v891_v47 = vmul.f32 %v1592_v59, %v889_v12  ;;  %v562_v54 = vmul.f32 %v1929_v33, %v538_v35  ;;  %943 = vst.msk [vmem:[%s2230_s1] sm:$0x1] %vm942_vm13, %v941_v27  ;;  %v563_v7 = vmul.f32 %v1932_v34, %v538_v35  ;;  %v604_v45 = vmul.f32 %v1924_v30, %v580_v46 }
 0x17a   : > { %v1074_v44 = vadd.f32 %v1073_v31, %v1072_v26  ;;  %v605_v33 = vmul.f32 %v1926_v32, %v580_v46 }
 0x17b   : > { %v568_v16 = vadd.f32 %v562_v54, %v526_v4  ;;  %945 = vst.msk [vmem:[%s2230_s1 - $0x1] sm:$0x2] %vm944_vm14, %v891_v47  ;;  %v569_v40 = vadd.f32 %v563_v7, %v527_v39 }
 0x17c   : > { %v1075_v28 = vrot.slane %v1074_v44, 1  ;;  %v622_v38 = vpop.permute.xlu1 %621 }
 0x17d   : > { %v646_v42 = vmul.f32 %v1936_v36, %v622_v38  ;;  %v647_v29 = vmul.f32 %v1938_v37, %v622_v38  ;;  %v610_v2 = vadd.f32 %v604_v45, %v568_v16  ;;  %v611_v48 = vadd.f32 %v605_v33, %v569_v40 }
 0x17e   : > { %v1076_v43 = vadd.f32 %v1075_v28, %v1074_v44 }
 0x17f   : > { %v652_v34 = vadd.f32 %v646_v42, %v610_v2  ;;  %v653_v49 = vadd.f32 %v647_v29, %v611_v48 }
 0x180   : > { %v1077_v30 = vmul.f32 0.00390625, %v1076_v43 }
 0x181   : > { %v670_v32 = vpop.permute.xlu1 %669 }
 0x182   : > { %v1078_v50 = vmul.f32 %v1592_v59, %v1077_v30  ;;  %v676_v51 = vadd.f32 %v670_v32, %v652_v34  ;;  %v677_v36 = vadd.f32 %v670_v32, %v653_v49 }
 0x184   : > { %678 = vst [vmem:[%s452_s5] sm:$0xff] %v676_v51  ;;  %679 = vst [vmem:[%s452_s5 + $0x8] sm:$0xff] %v677_v36 }
 0x185   : > { %1084 = vst.msk [vmem:[%s2230_s1] sm:$0x2] %vm944_vm14, %v1078_v50 }
 0x186   : > { %1690 = shalt.err (!%p1687_p3)
}
 0x187   : > { %s1691_s21 = scalar_lea.hbm %s2263_s4, 256  ;;  %s1695_s3 = scalar_lea.hbm %s2353_s10, 512 }
 0x188   : > { %p1692_p4 = scmp.ne.s32.totalorder %s2263_s4, %s1691_s21  ;;  %p1696_p9 = scmp.lt.u32.totalorder %s2263_s4, %s2353_s10 }
 0x189   : > { %p1697_p10 = scmp.lt.u32.totalorder %s1695_s3, %s1691_s21  ;;  %p1699_p12 = scmp.lt.u32.totalorder %s1691_s21, %s2263_s4 }
 0x18a   : > { %p1693_p7 = pnand %p1692_p4, %p1888_p5 }
 0x18b   : > { %p1698_p11 = por %p1697_p10, %p1696_p9 }
 0x18c   : > { %p1694_p8 = pneg %p1693_p7 }
 0x18d   : > { %p1700_p13 = por %p1699_p12, %p1698_p11 }
 0x18f   : > { %p1701_p0 = pnand %p1700_p13, %p1694_p8 }
 0x191   : > { %1704 = shalt.err (!%p1701_p0)
}
 0x192   : > { %1453 = dma.vmem_to_hbm [thread:$0]  (%p1888_p5), %s2265_s12, 256, %s2263_s4, %s2278_s15  }
 0x193   : > { %s1705_s16 = scalar_lea.vmem %s2272_s14, 32  ;;  %s1787_s30 = smov [#allocation9]  }
 0x194   : > { %p1706_p1 = scmp.ne.s32.totalorder %s2272_s14, %s1705_s16  ;;  %s1709_s2 = sshll.u32 %s1787_s30, 4  ;;  %s1710_s2 = int_to_ptr.vmem [resolvable:$false] %s1709_s2 }
 0x195   : > { %s1711_s0 = scalar_lea.vmem %s1710_s2, 64  ;;  %p1712_p4 = scmp.lt.s32.totalorder %s2272_s14, %s1710_s2 }
 0x196   : > { %p1707_p2 = pnand %p1706_p1, %p1888_p5  ;;  %p1713_p7 = scmp.lt.s32.totalorder %s1711_s0, %s1705_s16 }
 0x198   : > { %p1708_p3 = pneg %p1707_p2  ;;  %p1714_p8 = por %p1713_p7, %p1712_p4 }
 0x19a   : > { %p1715_p9 = pnand %p1714_p8, %p1708_p3 }
 0x19c   : > { %1718 = shalt.err (!%p1715_p9)
}
 0x19d   : > { %s1719_s12 = scalar_lea.hbm %s2270_s22, 32  ;;  %s1723_s24 = scalar_lea.hbm %s2354_s11, 64 }
 0x19e   : > { %p1720_p10 = scmp.ne.s32.totalorder %s2270_s22, %s1719_s12  ;;  %p1724_p13 = scmp.lt.u32.totalorder %s2270_s22, %s2354_s11 }
 0x19f   : > { %p1725_p0 = scmp.lt.u32.totalorder %s1723_s24, %s1719_s12  ;;  %p1727_p2 = scmp.lt.u32.totalorder %s1719_s12, %s2270_s22 }
 0x1a0   : > { %p1721_p11 = pnand %p1720_p10, %p1888_p5 }
 0x1a1   : > { %p1726_p1 = por %p1725_p0, %p1724_p13 }
 0x1a2   : > { %p1722_p12 = pneg %p1721_p11 }
 0x1a3   : > { %p1728_p3 = por %p1727_p2, %p1726_p1 }
 0x1a5   : > { %p1729_p4 = pnand %p1728_p3, %p1722_p12 }
 0x1a7   : > { %1732 = shalt.err (!%p1729_p4)
}
 0x1a8   : > { %1454 = dma.vmem_to_hbm [thread:$0]  (%p1888_p5), %s2272_s14, 32, %s2270_s22, %s2278_s15  }
 0x1a9 PF: > { %p1476_p7 = scmp.ge.s32.totalorder %s1775_s20, 2  ;;  %s1187_s5 = sand.u32 1, %s1763_s17  }
 0x1aa   : > { %s1188_s3 = scalar_lea.sflag [#allocation3], %s1187_s5 }
 0x1ab   : > { %p1461_p8 = pnand %p1476_p7, %p1892_p6 }
 0x1ad   : > { %1750 = dma.done.wait (!%p1461_p8), %s1188_s3, 64  }
 0x1ae   : > { %1752 = vsyncadd (!%p1461_p8), %s1188_s3, 4294967232  ;;  %s2382_s29 = sadd.s32 4294967294, %s1775_s20  }
 0x1af   : > { %s1196_s25 = sand.u32 1, %s2382_s29  }
 0x1b0   : > { %s1197_s16 = scalar_lea.sflag [#allocation5], %s1196_s25 }
 0x1b1   : > { %1754 = dma.done.wait (!%p1461_p8), %s1197_s16, 128  }
 0x1b2   : > { %1756 = vsyncadd (!%p1461_p8), %s1197_s16, 4294967168  ;;  %s1215_s27 = scalar_lea.sflag [#allocation8], %s1196_s25 }
 0x1b3   : > { %1758 = dma.done.wait (!%p1461_p8), %s1215_s27, 288  }
 0x1b4   : > { %1760 = vsyncadd (!%p1461_p8), %s1215_s27, 4294967008  ;;  %p28_p5 = scmp.ge.s32.totalorder %s1873_s23, 4   ;;  %s2383_s17 = smov %s1767_s18 }
 0x1b5   : > { %s2384_s18 = smov %s1771_s19  ;;  %s2385_s19 = smov %s1886_s26 }
 0x1b6   : > { %s2386_s20 = smov %s1873_s23  ;;  %30 = sbr.rel (!%p28_p5) target bundleno = 14 (0xe), region = 156 }
 0x1bd   :  { %1229 = vsyncpa [#allocation3], 1 }
 0x1be   :  { %1231 = vsyncpa [#allocation3 + $0x1], 1 }
 0x1bf   :  { %1232 = vsyncpa [#allocation5], 1 }
 0x1c0   :  { %1234 = vsyncpa [#allocation5 + $0x1], 1 }
 0x1c1   :  { %1235 = vsyncpa [#allocation8], 1 }
 0x1c2   :  { %1237 = vsyncpa [#allocation8 + $0x1], 1 }

</bundles_post_ra>
